<compile_context>
chip_gen: v7x
topology: tpu7x:2x2x1
jax: 0.10.0
libtpu: 0.0.40
codegen_flags: <defaults>
</compile_context>

<pallas_src>
import math

import jax
import jax.numpy as jnp
from jax.experimental import pallas as pl
from jax.experimental.pallas import tpu as pltpu

# ----------------------------- hyper-parameters -----------------------------
B = 2                   # batch
T = 8                   # sequence length (num patches)
DIM = 32                # model dim
DEPTH = 2               # transformer layers
HEADS = 4
DIM_HEAD = 8
INNER = HEADS * DIM_HEAD            # 32
MLP_RATIO = 4
MLP = MLP_RATIO * DIM               # 128
NCLASSES = 31
NOUT = NCLASSES + 1                 # 32
NDAYS = 4
MAX_REL_DIST = 16
LOOK_AHEAD = 0                      # create_temporal_mask(T, look_ahead)
LN_EPS = 1e-5
SCALE = DIM_HEAD ** (-0.5)
NEG = -1e9                          # additive mask (every row keeps >=1 live entry)


# ----------------------------- in-kernel helpers -----------------------------
def _ln_raw(x):
    """LayerNorm without affine (gamma/beta are folded into the next matmul)."""
    mean = jnp.mean(x, axis=-1, keepdims=True)
    var = jnp.mean((x - mean) ** 2, axis=-1, keepdims=True)
    return (x - mean) * jax.lax.rsqrt(var + LN_EPS)


def _erf(x):
    # Abramowitz & Stegun 7.1.26 (|err| <= 1.5e-7), built only from VPU/EUP ops
    # (abs/where/mul/add/exp) so it lowers on every TPU generation.
    p = 0.3275911
    a1, a2, a3, a4, a5 = (0.254829592, -0.284496736, 1.421413741,
                          -1.453152027, 1.061405429)
    sgn = jnp.where(x >= 0.0, 1.0, -1.0)
    ax = jnp.abs(x)
    t = 1.0 / (1.0 + p * ax)
    poly = ((((a5 * t + a4) * t + a3) * t + a2) * t + a1) * t
    return sgn * (1.0 - poly * jnp.exp(-(ax * ax)))


def _gelu(x):
    """Exact (erf-based) GELU, matching nn.GELU() default."""
    return 0.5 * x * (1.0 + _erf(x * (1.0 / math.sqrt(2.0))))


# --------------------------------- kernel -----------------------------------
def bit_kernel(x_ref, wqkv_ref, wo_ref, w1_ref, w2_ref, bias_ref, wp_ref, o_ref):
    """One grid step = one batch element (grid is 'parallel' -> both TCs on v7x).

    x_ref    : (1, T, DIM)                       activations for this batch item
    wqkv_ref : (DEPTH, HEADS, DIM+1, 3*DIM_HEAD) per-head [Wq|Wk|Wv] with LN1
               gamma/beta and the attention scale pre-folded; row DIM is the bias.
    wo_ref   : (DEPTH, INNER+1, DIM)             attn out-proj + bias row
    w1_ref   : (DEPTH, DIM+1, MLP)               FFN in-proj (LN2 folded) + bias row
    w2_ref   : (DEPTH, MLP+1, DIM)               FFN out-proj + bias row
    bias_ref : (DEPTH, T, T)                     rel-pos bias + temporal mask (NEG)
    wp_ref   : (DIM+1, NOUT)                     final projection (final LN folded)
    o_ref    : (1, T, NOUT)
    """
    x = x_ref[0]                                             # (T, DIM)

    for l in range(DEPTH):                                   # static unroll
        # ---------------- Attention (pre-norm, residual) ----------------
        xn = _ln_raw(x)                                      # affine folded away
        wqkv = wqkv_ref[l]                                   # (H, DIM+1, 3*dh)
        w3 = wqkv[:, :DIM, :]                                # (H, DIM, 3*dh)
        b3 = wqkv[:, DIM:, :]                                # (H, 1,   3*dh)
        xn3 = jnp.broadcast_to(xn[None, :, :], (HEADS, T, DIM))
        qkv = jnp.einsum("hnd,hdk->hnk", xn3, w3,
                         preferred_element_type=jnp.float32) + b3   # (H, T, 3*dh)
        q = qkv[:, :, :DIM_HEAD]                             # scale pre-folded
        k = qkv[:, :, DIM_HEAD:2 * DIM_HEAD]
        v = qkv[:, :, 2 * DIM_HEAD:]

        dots = jnp.einsum("hnd,hmd->hnm", q, k,
                          preferred_element_type=jnp.float32)        # (H, T, T)
        dots = dots + bias_ref[l]                            # rel bias + temporal mask
        m = jnp.max(dots, axis=-1, keepdims=True)
        e = jnp.exp(dots - m)
        attn = e / jnp.sum(e, axis=-1, keepdims=True)        # exact normalisation
        ctx3 = jnp.einsum("hnm,hmd->hnd", attn, v,
                          preferred_element_type=jnp.float32)        # (H, T, dh)
        ctx = jnp.concatenate([ctx3[h] for h in range(HEADS)], axis=1)  # (T, INNER)

        wo = wo_ref[l]
        x = x + jnp.dot(ctx, wo[:INNER, :],
                        preferred_element_type=jnp.float32) + wo[INNER:, :]

        # ---------------- FFN (pre-norm, residual) ----------------
        xn2 = _ln_raw(x)
        w1 = w1_ref[l]
        hid = jnp.dot(xn2, w1[:DIM, :],
                      preferred_element_type=jnp.float32) + w1[DIM:, :]
        hid = _gelu(hid)
        w2 = w2_ref[l]
        x = x + jnp.dot(hid, w2[:MLP, :],
                        preferred_element_type=jnp.float32) + w2[MLP:, :]

    # ---------------- final LayerNorm + projection ----------------
    xf = _ln_raw(x)
    wp = wp_ref[...]
    out = jnp.dot(xf, wp[:DIM, :],
                  preferred_element_type=jnp.float32) + wp[DIM:, :]
    o_ref[0] = out.astype(o_ref.dtype)


# ------------------------- wrapper-side weight prep --------------------------
def _fold_ln(gamma, beta, w, b=None):
    """LN(.)*W + b  ==  LNraw(.) @ (gamma[:,None]*W) + (beta @ W [+ b])."""
    wf = gamma[:, None] * w
    bf = beta @ w
    if b is not None:
        bf = bf + b
    return wf, bf


def pack_params(params):
    """One-time parameter preparation (review items 2/3/4):
    fold LN affine + attention scale into weights, regroup QKV per head,
    append biases as an extra weight row, bake rel-pos bias + temporal mask
    into one additive (T, T) matrix per layer."""
    assert LOOK_AHEAD >= 0  # guarantees every softmax row has a live entry
    i = jnp.arange(T)
    allowed = i[None, :] <= i[:, None] + LOOK_AHEAD
    rel_pos = (jnp.clip(i[:, None] - i[None, :], -MAX_REL_DIST + 1,
                        MAX_REL_DIST - 1) + MAX_REL_DIST - 1)

    wqkv_l, wo_l, w1_l, w2_l, bias_l = [], [], [], [], []
    for lp in params["layers"]:
        wq_f, bq_f = _fold_ln(lp["ln1_g"], lp["ln1_b"], lp["w_qkv"])
        wq_f = wq_f.at[:, :INNER].multiply(SCALE)       # fold attention scale (Q)
        bq_f = bq_f.at[:INNER].multiply(SCALE)
        per_head = []
        for h in range(HEADS):
            cols = [slice(h * DIM_HEAD, (h + 1) * DIM_HEAD),
                    slice(INNER + h * DIM_HEAD, INNER + (h + 1) * DIM_HEAD),
                    slice(2 * INNER + h * DIM_HEAD, 2 * INNER + (h + 1) * DIM_HEAD)]
            w_h = jnp.concatenate([wq_f[:, c] for c in cols], axis=1)   # (DIM, 3*dh)
            b_h = jnp.concatenate([bq_f[c] for c in cols])[None, :]     # (1,   3*dh)
            per_head.append(jnp.concatenate([w_h, b_h], axis=0))        # (DIM+1, 3*dh)
        wqkv_l.append(jnp.stack(per_head, axis=0))                      # (H, DIM+1, 3*dh)

        wo_l.append(jnp.concatenate([lp["w_out"], lp["b_out"][None, :]], axis=0))

        w1f, b1f = _fold_ln(lp["ln2_g"], lp["ln2_b"], lp["w_ff1"], lp["b_ff1"])
        w1_l.append(jnp.concatenate([w1f, b1f[None, :]], axis=0))
        w2_l.append(jnp.concatenate([lp["w_ff2"], lp["b_ff2"][None, :]], axis=0))

        rel_bias = lp["rel_table"][rel_pos, 0]                          # (T, T)
        bias_l.append(jnp.where(allowed, rel_bias, NEG))

    wpf, bpf = _fold_ln(params["lnf_g"], params["lnf_b"],
                        params["w_proj"], params["b_proj"])
    wpb = jnp.concatenate([wpf, bpf[None, :]], axis=0)                  # (DIM+1, NOUT)

    return (jnp.stack(wqkv_l).astype(jnp.float32),
            jnp.stack(wo_l).astype(jnp.float32),
            jnp.stack(w1_l).astype(jnp.float32),
            jnp.stack(w2_l).astype(jnp.float32),
            jnp.stack(bias_l).astype(jnp.float32),
            wpb.astype(jnp.float32))


def bit_phoneme_pallas(neural, x_len, day_idx, params):
    """BiT_Phoneme.forward (mae_mode=True, eval).  x_len / day_idx are accepted
    for API parity: the reference forward computes the per-day transform but
    never consumes it, and X_len is only used by training-time SpecAugment."""
    del x_len, day_idx
    assert neural.shape == (B, T, DIM)

    with jax.default_matmul_precision("float32"):      # exact host-side folding
        wqkv, wo, w1, w2, bias, wpb = pack_params(params)

    const2 = lambda b: (0, 0)
    const3 = lambda b: (0, 0, 0)
    const4 = lambda b: (0, 0, 0, 0)

    out = pl.pallas_call(
        bit_kernel,
        out_shape=jax.ShapeDtypeStruct((B, T, NOUT), jnp.float32),
        grid=(B,),
        in_specs=[
            pl.BlockSpec((1, T, DIM), lambda b: (b, 0, 0)),             # activations
            pl.BlockSpec((DEPTH, HEADS, DIM + 1, 3 * DIM_HEAD), const4),
            pl.BlockSpec((DEPTH, INNER + 1, DIM), const3),
            pl.BlockSpec((DEPTH, DIM + 1, MLP), const3),
            pl.BlockSpec((DEPTH, MLP + 1, DIM), const3),
            pl.BlockSpec((DEPTH, T, T), const3),
            pl.BlockSpec((DIM + 1, NOUT), const2),
        ],
        out_specs=pl.BlockSpec((1, T, NOUT), lambda b: (b, 0, 0)),
        compiler_params=pltpu.CompilerParams(
            dimension_semantics=("parallel",)),
    )(neural, wqkv, wo, w1, w2, bias, wpb)
    return out


# --------------------- pure-JAX reference (mirrors PyTorch) -------------------
def bit_phoneme_ref(neural, day_idx, params):
    """Literal mirror of BiT_Phoneme.forward (mae_mode=True, eval):
    transformedNeural (day einsum + Softsign) is computed but unused in the
    PyTorch code, so x = neuralInput feeds the transformer directly."""
    del day_idx
    x = neural
    i = jnp.arange(T)
    allowed = i[None, :] <= i[:, None] + LOOK_AHEAD
    rel_pos = (jnp.clip(i[:, None] - i[None, :], -MAX_REL_DIST + 1,
                        MAX_REL_DIST - 1) + MAX_REL_DIST - 1)

    def ln(v, g, b):
        mu = jnp.mean(v, -1, keepdims=True)
        var = jnp.mean((v - mu) ** 2, -1, keepdims=True)
        return (v - mu) * jax.lax.rsqrt(var + LN_EPS) * g + b

    for lp in params["layers"]:
        xn = ln(x, lp["ln1_g"], lp["ln1_b"])
        qkv = xn @ lp["w_qkv"]
        q, k, v = jnp.split(qkv, 3, axis=-1)
        sh = lambda t: t.reshape(B, T, HEADS, DIM_HEAD).transpose(0, 2, 1, 3)
        q, k, v = sh(q), sh(k), sh(v)
        dots = jnp.einsum("bhnd,bhmd->bhnm", q, k) * SCALE
        rel_bias = lp["rel_table"][rel_pos, 0]
        dots = dots + rel_bias[None, None]
        dots = jnp.where(allowed[None, None], dots, NEG)     # masked_fill(-inf)
        attn = jax.nn.softmax(dots, axis=-1)
        o = jnp.einsum("bhnm,bhmd->bhnd", attn, v)
        o = o.transpose(0, 2, 1, 3).reshape(B, T, INNER)
        x = o @ lp["w_out"] + lp["b_out"] + x

        xn2 = ln(x, lp["ln2_g"], lp["ln2_b"])
        hid = xn2 @ lp["w_ff1"] + lp["b_ff1"]
        hid = jax.nn.gelu(hid, approximate=False)            # nn.GELU() default
        x = hid @ lp["w_ff2"] + lp["b_ff2"] + x

    xf = ln(x, params["lnf_g"], params["lnf_b"])
    return xf @ params["w_proj"] + params["b_proj"]


# ----------------------------------- main ------------------------------------
if __name__ == "__main__":
    key = jax.random.PRNGKey(0)
    keys = iter(jax.random.split(key, 64))

    def rn(shape, scale=1.0):
        return jax.random.normal(next(keys), shape, dtype=jnp.float32) * scale

    layers = []
    for _ in range(DEPTH):
        layers.append(dict(
            ln1_g=1.0 + 0.1 * rn((DIM,)), ln1_b=0.1 * rn((DIM,)),
            w_qkv=rn((DIM, 3 * INNER), 1.0 / math.sqrt(DIM)),
            w_out=rn((INNER, DIM), 1.0 / math.sqrt(INNER)),
            b_out=0.02 * rn((DIM,)),
            ln2_g=1.0 + 0.1 * rn((DIM,)), ln2_b=0.1 * rn((DIM,)),
            w_ff1=rn((DIM, MLP), 1.0 / math.sqrt(DIM)),
            b_ff1=0.02 * rn((MLP,)),
            w_ff2=rn((MLP, DIM), 1.0 / math.sqrt(MLP)),
            b_ff2=0.02 * rn((DIM,)),
            rel_table=rn((2 * MAX_REL_DIST - 1, 1)),     # nn.Embedding(2*mrd-1, 1)
        ))
    params = dict(
        layers=layers,
        lnf_g=1.0 + 0.1 * rn((DIM,)), lnf_b=0.1 * rn((DIM,)),
        w_proj=rn((DIM, NOUT), 1.0 / math.sqrt(DIM)),
        b_proj=0.02 * rn((NOUT,)),
        # Present in the module, but its output is never consumed by forward().
        dayW=rn((NDAYS, DIM, DIM)), dayB=0.02 * rn((NDAYS, 1, DIM)),
    )

    neural = rn((B, T, DIM))
    x_len = jnp.full((B,), T, dtype=jnp.int32)
    day_idx = jnp.array([1, 3], dtype=jnp.int32)

    out = bit_phoneme_pallas(neural, x_len, day_idx, params)
    out = jax.block_until_ready(out)

    with jax.default_matmul_precision("float32"):
        ref = bit_phoneme_ref(neural, day_idx, params)

    assert out.shape == (B, T, NOUT)
    err = float(jnp.max(jnp.abs(out - ref)))
    assert err < 1e-3, f"max abs error {err} vs pure-JAX reference"
    print("KERNEL_OK")
</pallas_src>

<mosaic_0001>
module attributes {stable_mosaic.version = 11 : i64} {
  func.func @bit_kernel(%arg0: i32, %arg1: memref<1x8x32xf32, #tpu.memory_space<vmem>>, %arg2: memref<2x4x33x24xf32, #tpu.memory_space<vmem>>, %arg3: memref<2x33x32xf32, #tpu.memory_space<vmem>>, %arg4: memref<2x33x128xf32, #tpu.memory_space<vmem>>, %arg5: memref<2x129x32xf32, #tpu.memory_space<vmem>>, %arg6: memref<2x8x8xf32, #tpu.memory_space<vmem>>, %arg7: memref<33x32xf32, #tpu.memory_space<vmem>>, %arg8: memref<1x8x32xf32, #tpu.memory_space<vmem>>) attributes {dimension_semantics = [#tpu.dimension_semantics<parallel>], iteration_bounds = array<i64: 2>, scalar_prefetch = 0 : i64, scratch_operands = 0 : i64, tpu.core_type = #tpu.core_type<tc>, window_params = [{transform_indices = @transform_0, window_bounds = array<i64: 1, 8, 32>}, {pipeline_mode = #tpu.pipeline_mode<synchronous>, transform_indices = @transform_1, window_bounds = array<i64: 2, 4, 33, 24>}, {pipeline_mode = #tpu.pipeline_mode<synchronous>, transform_indices = @transform_2, window_bounds = array<i64: 2, 33, 32>}, {pipeline_mode = #tpu.pipeline_mode<synchronous>, transform_indices = @transform_3, window_bounds = array<i64: 2, 33, 128>}, {pipeline_mode = #tpu.pipeline_mode<synchronous>, transform_indices = @transform_4, window_bounds = array<i64: 2, 129, 32>}, {pipeline_mode = #tpu.pipeline_mode<synchronous>, transform_indices = @transform_5, window_bounds = array<i64: 2, 8, 8>}, {pipeline_mode = #tpu.pipeline_mode<synchronous>, transform_indices = @transform_6, window_bounds = array<i64: 33, 32>}, {transform_indices = @transform_7, window_bounds = array<i64: 1, 8, 32>}]} {
    %c0 = arith.constant 0 : index
    %c0_0 = arith.constant 0 : index
    %c0_1 = arith.constant 0 : index
    %0 = vector.load %arg1[%c0, %c0_0, %c0_1] : memref<1x8x32xf32, #tpu.memory_space<vmem>>, vector<1x8x32xf32>
    %1 = vector.shape_cast %0 : vector<1x8x32xf32> to vector<8x32xf32>
    %cst = arith.constant dense<0.000000e+00> : vector<8xf32>
    %2 = vector.multi_reduction <add>, %1, %cst [1] : vector<8x32xf32> to vector<8xf32>
    %3 = vector.shape_cast %2 : vector<8xf32> to vector<8x1xf32>
    %cst_2 = arith.constant 3.200000e+01 : f32
    %4 = vector.broadcast %cst_2 : f32 to vector<8x1xf32>
    %5 = arith.divf %3, %4 : vector<8x1xf32>
    %6 = vector.broadcast %5 : vector<8x1xf32> to vector<8x32xf32>
    %7 = arith.subf %1, %6 : vector<8x32xf32>
    %8 = arith.mulf %7, %7 : vector<8x32xf32>
    %cst_3 = arith.constant dense<0.000000e+00> : vector<8xf32>
    %9 = vector.multi_reduction <add>, %8, %cst_3 [1] : vector<8x32xf32> to vector<8xf32>
    %10 = vector.shape_cast %9 : vector<8xf32> to vector<8x1xf32>
    %cst_4 = arith.constant 3.200000e+01 : f32
    %11 = vector.broadcast %cst_4 : f32 to vector<8x1xf32>
    %12 = arith.divf %10, %11 : vector<8x1xf32>
    %13 = vector.broadcast %5 : vector<8x1xf32> to vector<8x32xf32>
    %14 = arith.subf %1, %13 : vector<8x32xf32>
    %cst_5 = arith.constant 9.99999974E-6 : f32
    %15 = vector.broadcast %cst_5 : f32 to vector<8x1xf32>
    %16 = arith.addf %12, %15 : vector<8x1xf32>
    %17 = math.rsqrt %16 : vector<8x1xf32>
    %18 = vector.broadcast %17 : vector<8x1xf32> to vector<8x32xf32>
    %19 = arith.mulf %14, %18 : vector<8x32xf32>
    %c0_6 = arith.constant 0 : index
    %c0_7 = arith.constant 0 : index
    %c0_8 = arith.constant 0 : index
    %c0_9 = arith.constant 0 : index
    %20 = vector.load %arg2[%c0_6, %c0_7, %c0_8, %c0_9] : memref<2x4x33x24xf32, #tpu.memory_space<vmem>>, vector<1x4x33x24xf32>
    %21 = vector.shape_cast %20 : vector<1x4x33x24xf32> to vector<4x33x24xf32>
    %22 = vector.extract_strided_slice %21 {offsets = [0, 0, 0], sizes = [4, 32, 24], strides = [1, 1, 1]} : vector<4x33x24xf32> to vector<4x32x24xf32>
    %23 = vector.extract_strided_slice %21 {offsets = [0, 32, 0], sizes = [4, 1, 24], strides = [1, 1, 1]} : vector<4x33x24xf32> to vector<4x1x24xf32>
    %24 = vector.shape_cast %19 : vector<8x32xf32> to vector<1x8x32xf32>
    %25 = vector.shape_cast %24 : vector<1x8x32xf32> to vector<1x8x32xf32>
    %26 = vector.broadcast %25 : vector<1x8x32xf32> to vector<4x8x32xf32>
    "tpu.trace_start"() <{level = 10 : i32, message = "hnd,hdk->hnk"}> : () -> ()
    %cst_10 = arith.constant dense<0.000000e+00> : vector<4x8x24xf32>
    %27 = tpu.matmul %26, %22, %cst_10 {dimension_numbers = #tpu.dot_dimension_numbers<[2], [1], [1], [2], [0, 0, 0, 1, 1, 2], [0], [0]>} : vector<4x8x32xf32>, vector<4x32x24xf32>, vector<4x8x24xf32> -> vector<4x8x24xf32>
    "tpu.trace_stop"() : () -> ()
    %28 = vector.broadcast %23 : vector<4x1x24xf32> to vector<4x8x24xf32>
    %29 = arith.addf %27, %28 : vector<4x8x24xf32>
    %30 = vector.extract_strided_slice %29 {offsets = [0, 0, 0], sizes = [4, 8, 8], strides = [1, 1, 1]} : vector<4x8x24xf32> to vector<4x8x8xf32>
    %31 = vector.extract_strided_slice %29 {offsets = [0, 0, 8], sizes = [4, 8, 8], strides = [1, 1, 1]} : vector<4x8x24xf32> to vector<4x8x8xf32>
    %32 = vector.extract_strided_slice %29 {offsets = [0, 0, 16], sizes = [4, 8, 8], strides = [1, 1, 1]} : vector<4x8x24xf32> to vector<4x8x8xf32>
    "tpu.trace_start"() <{level = 10 : i32, message = "hnd,hmd->hnm"}> : () -> ()
    %cst_11 = arith.constant dense<0.000000e+00> : vector<4x8x8xf32>
    %33 = tpu.matmul %30, %31, %cst_11 {dimension_numbers = #tpu.dot_dimension_numbers<[2], [2], [1], [1], [0, 0, 0, 1, 1, 1], [0], [0]>} : vector<4x8x8xf32>, vector<4x8x8xf32>, vector<4x8x8xf32> -> vector<4x8x8xf32>
    "tpu.trace_stop"() : () -> ()
    %c0_12 = arith.constant 0 : index
    %c0_13 = arith.constant 0 : index
    %c0_14 = arith.constant 0 : index
    %34 = vector.load %arg6[%c0_12, %c0_13, %c0_14] : memref<2x8x8xf32, #tpu.memory_space<vmem>>, vector<1x8x8xf32>
    %35 = vector.shape_cast %34 : vector<1x8x8xf32> to vector<8x8xf32>
    %36 = vector.shape_cast %35 : vector<8x8xf32> to vector<1x8x8xf32>
    %37 = vector.broadcast %36 : vector<1x8x8xf32> to vector<4x8x8xf32>
    %38 = arith.addf %33, %37 : vector<4x8x8xf32>
    %cst_15 = arith.constant dense<0xFF800000> : vector<4x8xf32>
    %39 = vector.multi_reduction <maximumf>, %38, %cst_15 [2] : vector<4x8x8xf32> to vector<4x8xf32>
    %40 = vector.shape_cast %39 : vector<4x8xf32> to vector<4x8x1xf32>
    %41 = vector.broadcast %40 : vector<4x8x1xf32> to vector<4x8x8xf32>
    %42 = arith.subf %38, %41 : vector<4x8x8xf32>
    %43 = math.exp %42 : vector<4x8x8xf32>
    %cst_16 = arith.constant dense<0.000000e+00> : vector<4x8xf32>
    %44 = vector.multi_reduction <add>, %43, %cst_16 [2] : vector<4x8x8xf32> to vector<4x8xf32>
    %45 = vector.shape_cast %44 : vector<4x8xf32> to vector<4x8x1xf32>
    %46 = vector.broadcast %45 : vector<4x8x1xf32> to vector<4x8x8xf32>
    %47 = arith.divf %43, %46 : vector<4x8x8xf32>
    "tpu.trace_start"() <{level = 10 : i32, message = "hnm,hmd->hnd"}> : () -> ()
    %cst_17 = arith.constant dense<0.000000e+00> : vector<4x8x8xf32>
    %48 = tpu.matmul %47, %32, %cst_17 {dimension_numbers = #tpu.dot_dimension_numbers<[2], [1], [1], [2], [0, 0, 0, 1, 1, 2], [0], [0]>} : vector<4x8x8xf32>, vector<4x8x8xf32>, vector<4x8x8xf32> -> vector<4x8x8xf32>
    "tpu.trace_stop"() : () -> ()
    %49 = vector.extract_strided_slice %48 {offsets = [0, 0, 0], sizes = [1, 8, 8], strides = [1, 1, 1]} : vector<4x8x8xf32> to vector<1x8x8xf32>
    %50 = vector.shape_cast %49 : vector<1x8x8xf32> to vector<8x8xf32>
    %51 = vector.extract_strided_slice %48 {offsets = [1, 0, 0], sizes = [1, 8, 8], strides = [1, 1, 1]} : vector<4x8x8xf32> to vector<1x8x8xf32>
    %52 = vector.shape_cast %51 : vector<1x8x8xf32> to vector<8x8xf32>
    %53 = vector.extract_strided_slice %48 {offsets = [2, 0, 0], sizes = [1, 8, 8], strides = [1, 1, 1]} : vector<4x8x8xf32> to vector<1x8x8xf32>
    %54 = vector.shape_cast %53 : vector<1x8x8xf32> to vector<8x8xf32>
    %55 = vector.extract_strided_slice %48 {offsets = [3, 0, 0], sizes = [1, 8, 8], strides = [1, 1, 1]} : vector<4x8x8xf32> to vector<1x8x8xf32>
    %56 = vector.shape_cast %55 : vector<1x8x8xf32> to vector<8x8xf32>
    %57 = tpu.concatenate %50, %52, %54, %56 in 1 : vector<8x8xf32>, vector<8x8xf32>, vector<8x8xf32>, vector<8x8xf32> -> vector<8x32xf32>
    %c0_18 = arith.constant 0 : index
    %c0_19 = arith.constant 0 : index
    %c0_20 = arith.constant 0 : index
    %58 = vector.load %arg3[%c0_18, %c0_19, %c0_20] : memref<2x33x32xf32, #tpu.memory_space<vmem>>, vector<1x33x32xf32>
    %59 = vector.shape_cast %58 : vector<1x33x32xf32> to vector<33x32xf32>
    %60 = vector.extract_strided_slice %59 {offsets = [0, 0], sizes = [32, 32], strides = [1, 1]} : vector<33x32xf32> to vector<32x32xf32>
    %cst_21 = arith.constant dense<0.000000e+00> : vector<8x32xf32>
    %61 = tpu.matmul %57, %60, %cst_21 {dimension_numbers = #tpu.dot_dimension_numbers<[1], [0], [0], [1], [0, 0, 1, 1], [], []>} : vector<8x32xf32>, vector<32x32xf32>, vector<8x32xf32> -> vector<8x32xf32>
    %62 = arith.addf %1, %61 : vector<8x32xf32>
    %63 = vector.extract_strided_slice %59 {offsets = [32, 0], sizes = [1, 32], strides = [1, 1]} : vector<33x32xf32> to vector<1x32xf32>
    %64 = vector.broadcast %63 : vector<1x32xf32> to vector<8x32xf32>
    %65 = arith.addf %62, %64 : vector<8x32xf32>
    %cst_22 = arith.constant dense<0.000000e+00> : vector<8xf32>
    %66 = vector.multi_reduction <add>, %65, %cst_22 [1] : vector<8x32xf32> to vector<8xf32>
    %67 = vector.shape_cast %66 : vector<8xf32> to vector<8x1xf32>
    %cst_23 = arith.constant 3.200000e+01 : f32
    %68 = vector.broadcast %cst_23 : f32 to vector<8x1xf32>
    %69 = arith.divf %67, %68 : vector<8x1xf32>
    %70 = vector.broadcast %69 : vector<8x1xf32> to vector<8x32xf32>
    %71 = arith.subf %65, %70 : vector<8x32xf32>
    %72 = arith.mulf %71, %71 : vector<8x32xf32>
    %cst_24 = arith.constant dense<0.000000e+00> : vector<8xf32>
    %73 = vector.multi_reduction <add>, %72, %cst_24 [1] : vector<8x32xf32> to vector<8xf32>
    %74 = vector.shape_cast %73 : vector<8xf32> to vector<8x1xf32>
    %cst_25 = arith.constant 3.200000e+01 : f32
    %75 = vector.broadcast %cst_25 : f32 to vector<8x1xf32>
    %76 = arith.divf %74, %75 : vector<8x1xf32>
    %77 = vector.broadcast %69 : vector<8x1xf32> to vector<8x32xf32>
    %78 = arith.subf %65, %77 : vector<8x32xf32>
    %cst_26 = arith.constant 9.99999974E-6 : f32
    %79 = vector.broadcast %cst_26 : f32 to vector<8x1xf32>
    %80 = arith.addf %76, %79 : vector<8x1xf32>
    %81 = math.rsqrt %80 : vector<8x1xf32>
    %82 = vector.broadcast %81 : vector<8x1xf32> to vector<8x32xf32>
    %83 = arith.mulf %78, %82 : vector<8x32xf32>
    %c0_27 = arith.constant 0 : index
    %c0_28 = arith.constant 0 : index
    %c0_29 = arith.constant 0 : index
    %84 = vector.load %arg4[%c0_27, %c0_28, %c0_29] : memref<2x33x128xf32, #tpu.memory_space<vmem>>, vector<1x33x128xf32>
    %85 = vector.shape_cast %84 : vector<1x33x128xf32> to vector<33x128xf32>
    %86 = vector.extract_strided_slice %85 {offsets = [0, 0], sizes = [32, 128], strides = [1, 1]} : vector<33x128xf32> to vector<32x128xf32>
    %cst_30 = arith.constant dense<0.000000e+00> : vector<8x128xf32>
    %87 = tpu.matmul %83, %86, %cst_30 {dimension_numbers = #tpu.dot_dimension_numbers<[1], [0], [0], [1], [0, 0, 1, 1], [], []>} : vector<8x32xf32>, vector<32x128xf32>, vector<8x128xf32> -> vector<8x128xf32>
    %88 = vector.extract_strided_slice %85 {offsets = [32, 0], sizes = [1, 128], strides = [1, 1]} : vector<33x128xf32> to vector<1x128xf32>
    %89 = vector.broadcast %88 : vector<1x128xf32> to vector<8x128xf32>
    %90 = arith.addf %87, %89 : vector<8x128xf32>
    %cst_31 = arith.constant 5.000000e-01 : f32
    %91 = vector.broadcast %cst_31 : f32 to vector<8x128xf32>
    %92 = arith.mulf %91, %90 : vector<8x128xf32>
    %cst_32 = arith.constant 0.707106769 : f32
    %93 = vector.broadcast %cst_32 : f32 to vector<8x128xf32>
    %94 = arith.mulf %90, %93 : vector<8x128xf32>
    %cst_33 = arith.constant 0.000000e+00 : f32
    %95 = vector.broadcast %cst_33 : f32 to vector<8x128xf32>
    %96 = arith.cmpf oge, %94, %95 : vector<8x128xf32>
    %cst_34 = arith.constant 1.000000e+00 : f32
    %cst_35 = arith.constant -1.000000e+00 : f32
    %97 = vector.broadcast %cst_34 : f32 to vector<8x128xf32>
    %98 = vector.broadcast %cst_35 : f32 to vector<8x128xf32>
    %99 = arith.select %96, %97, %98 : vector<8x128xi1>, vector<8x128xf32>
    %100 = math.absf %94 : vector<8x128xf32>
    %cst_36 = arith.constant 0.327591091 : f32
    %101 = vector.broadcast %cst_36 : f32 to vector<8x128xf32>
    %102 = arith.mulf %101, %100 : vector<8x128xf32>
    %cst_37 = arith.constant 1.000000e+00 : f32
    %103 = vector.broadcast %cst_37 : f32 to vector<8x128xf32>
    %104 = arith.addf %103, %102 : vector<8x128xf32>
    %cst_38 = arith.constant 1.000000e+00 : f32
    %105 = vector.broadcast %cst_38 : f32 to vector<8x128xf32>
    %106 = arith.divf %105, %104 : vector<8x128xf32>
    %cst_39 = arith.constant 1.06140542 : f32
    %107 = vector.broadcast %cst_39 : f32 to vector<8x128xf32>
    %108 = arith.mulf %107, %106 : vector<8x128xf32>
    %cst_40 = arith.constant -1.45315206 : f32
    %109 = vector.broadcast %cst_40 : f32 to vector<8x128xf32>
    %110 = arith.addf %108, %109 : vector<8x128xf32>
    %111 = arith.mulf %110, %106 : vector<8x128xf32>
    %cst_41 = arith.constant 1.42141378 : f32
    %112 = vector.broadcast %cst_41 : f32 to vector<8x128xf32>
    %113 = arith.addf %111, %112 : vector<8x128xf32>
    %114 = arith.mulf %113, %106 : vector<8x128xf32>
    %cst_42 = arith.constant -0.284496725 : f32
    %115 = vector.broadcast %cst_42 : f32 to vector<8x128xf32>
    %116 = arith.addf %114, %115 : vector<8x128xf32>
    %117 = arith.mulf %116, %106 : vector<8x128xf32>
    %cst_43 = arith.constant 0.254829586 : f32
    %118 = vector.broadcast %cst_43 : f32 to vector<8x128xf32>
    %119 = arith.addf %117, %118 : vector<8x128xf32>
    %120 = arith.mulf %119, %106 : vector<8x128xf32>
    %121 = arith.mulf %100, %100 : vector<8x128xf32>
    %cst_44 = arith.constant 0.000000e+00 : f32
    %122 = vector.broadcast %cst_44 : f32 to vector<8x128xf32>
    %123 = arith.subf %122, %121 : vector<8x128xf32>
    %124 = math.exp %123 : vector<8x128xf32>
    %125 = arith.mulf %120, %124 : vector<8x128xf32>
    %cst_45 = arith.constant 1.000000e+00 : f32
    %126 = vector.broadcast %cst_45 : f32 to vector<8x128xf32>
    %127 = arith.subf %126, %125 : vector<8x128xf32>
    %128 = arith.mulf %99, %127 : vector<8x128xf32>
    %cst_46 = arith.constant 1.000000e+00 : f32
    %129 = vector.broadcast %cst_46 : f32 to vector<8x128xf32>
    %130 = arith.addf %129, %128 : vector<8x128xf32>
    %131 = arith.mulf %92, %130 : vector<8x128xf32>
    %c0_47 = arith.constant 0 : index
    %c0_48 = arith.constant 0 : index
    %c0_49 = arith.constant 0 : index
    %132 = vector.load %arg5[%c0_47, %c0_48, %c0_49] : memref<2x129x32xf32, #tpu.memory_space<vmem>>, vector<1x129x32xf32>
    %133 = vector.shape_cast %132 : vector<1x129x32xf32> to vector<129x32xf32>
    %134 = vector.extract_strided_slice %133 {offsets = [0, 0], sizes = [128, 32], strides = [1, 1]} : vector<129x32xf32> to vector<128x32xf32>
    %cst_50 = arith.constant dense<0.000000e+00> : vector<8x32xf32>
    %135 = tpu.matmul %131, %134, %cst_50 {dimension_numbers = #tpu.dot_dimension_numbers<[1], [0], [0], [1], [0, 0, 1, 1], [], []>} : vector<8x128xf32>, vector<128x32xf32>, vector<8x32xf32> -> vector<8x32xf32>
    %136 = arith.addf %65, %135 : vector<8x32xf32>
    %137 = vector.extract_strided_slice %133 {offsets = [128, 0], sizes = [1, 32], strides = [1, 1]} : vector<129x32xf32> to vector<1x32xf32>
    %138 = vector.broadcast %137 : vector<1x32xf32> to vector<8x32xf32>
    %139 = arith.addf %136, %138 : vector<8x32xf32>
    %cst_51 = arith.constant dense<0.000000e+00> : vector<8xf32>
    %140 = vector.multi_reduction <add>, %139, %cst_51 [1] : vector<8x32xf32> to vector<8xf32>
    %141 = vector.shape_cast %140 : vector<8xf32> to vector<8x1xf32>
    %cst_52 = arith.constant 3.200000e+01 : f32
    %142 = vector.broadcast %cst_52 : f32 to vector<8x1xf32>
    %143 = arith.divf %141, %142 : vector<8x1xf32>
    %144 = vector.broadcast %143 : vector<8x1xf32> to vector<8x32xf32>
    %145 = arith.subf %139, %144 : vector<8x32xf32>
    %146 = arith.mulf %145, %145 : vector<8x32xf32>
    %cst_53 = arith.constant dense<0.000000e+00> : vector<8xf32>
    %147 = vector.multi_reduction <add>, %146, %cst_53 [1] : vector<8x32xf32> to vector<8xf32>
    %148 = vector.shape_cast %147 : vector<8xf32> to vector<8x1xf32>
    %cst_54 = arith.constant 3.200000e+01 : f32
    %149 = vector.broadcast %cst_54 : f32 to vector<8x1xf32>
    %150 = arith.divf %148, %149 : vector<8x1xf32>
    %151 = vector.broadcast %143 : vector<8x1xf32> to vector<8x32xf32>
    %152 = arith.subf %139, %151 : vector<8x32xf32>
    %cst_55 = arith.constant 9.99999974E-6 : f32
    %153 = vector.broadcast %cst_55 : f32 to vector<8x1xf32>
    %154 = arith.addf %150, %153 : vector<8x1xf32>
    %155 = math.rsqrt %154 : vector<8x1xf32>
    %156 = vector.broadcast %155 : vector<8x1xf32> to vector<8x32xf32>
    %157 = arith.mulf %152, %156 : vector<8x32xf32>
    %c1 = arith.constant 1 : index
    %c0_56 = arith.constant 0 : index
    %c0_57 = arith.constant 0 : index
    %c0_58 = arith.constant 0 : index
    %158 = vector.load %arg2[%c1, %c0_56, %c0_57, %c0_58] : memref<2x4x33x24xf32, #tpu.memory_space<vmem>>, vector<1x4x33x24xf32>
    %159 = vector.shape_cast %158 : vector<1x4x33x24xf32> to vector<4x33x24xf32>
    %160 = vector.extract_strided_slice %159 {offsets = [0, 0, 0], sizes = [4, 32, 24], strides = [1, 1, 1]} : vector<4x33x24xf32> to vector<4x32x24xf32>
    %161 = vector.extract_strided_slice %159 {offsets = [0, 32, 0], sizes = [4, 1, 24], strides = [1, 1, 1]} : vector<4x33x24xf32> to vector<4x1x24xf32>
    %162 = vector.shape_cast %157 : vector<8x32xf32> to vector<1x8x32xf32>
    %163 = vector.shape_cast %162 : vector<1x8x32xf32> to vector<1x8x32xf32>
    %164 = vector.broadcast %163 : vector<1x8x32xf32> to vector<4x8x32xf32>
    "tpu.trace_start"() <{level = 10 : i32, message = "hnd,hdk->hnk"}> : () -> ()
    %cst_59 = arith.constant dense<0.000000e+00> : vector<4x8x24xf32>
    %165 = tpu.matmul %164, %160, %cst_59 {dimension_numbers = #tpu.dot_dimension_numbers<[2], [1], [1], [2], [0, 0, 0, 1, 1, 2], [0], [0]>} : vector<4x8x32xf32>, vector<4x32x24xf32>, vector<4x8x24xf32> -> vector<4x8x24xf32>
    "tpu.trace_stop"() : () -> ()
    %166 = vector.broadcast %161 : vector<4x1x24xf32> to vector<4x8x24xf32>
    %167 = arith.addf %165, %166 : vector<4x8x24xf32>
    %168 = vector.extract_strided_slice %167 {offsets = [0, 0, 0], sizes = [4, 8, 8], strides = [1, 1, 1]} : vector<4x8x24xf32> to vector<4x8x8xf32>
    %169 = vector.extract_strided_slice %167 {offsets = [0, 0, 8], sizes = [4, 8, 8], strides = [1, 1, 1]} : vector<4x8x24xf32> to vector<4x8x8xf32>
    %170 = vector.extract_strided_slice %167 {offsets = [0, 0, 16], sizes = [4, 8, 8], strides = [1, 1, 1]} : vector<4x8x24xf32> to vector<4x8x8xf32>
    "tpu.trace_start"() <{level = 10 : i32, message = "hnd,hmd->hnm"}> : () -> ()
    %cst_60 = arith.constant dense<0.000000e+00> : vector<4x8x8xf32>
    %171 = tpu.matmul %168, %169, %cst_60 {dimension_numbers = #tpu.dot_dimension_numbers<[2], [2], [1], [1], [0, 0, 0, 1, 1, 1], [0], [0]>} : vector<4x8x8xf32>, vector<4x8x8xf32>, vector<4x8x8xf32> -> vector<4x8x8xf32>
    "tpu.trace_stop"() : () -> ()
    %c1_61 = arith.constant 1 : index
    %c0_62 = arith.constant 0 : index
    %c0_63 = arith.constant 0 : index
    %172 = vector.load %arg6[%c1_61, %c0_62, %c0_63] : memref<2x8x8xf32, #tpu.memory_space<vmem>>, vector<1x8x8xf32>
    %173 = vector.shape_cast %172 : vector<1x8x8xf32> to vector<8x8xf32>
    %174 = vector.shape_cast %173 : vector<8x8xf32> to vector<1x8x8xf32>
    %175 = vector.broadcast %174 : vector<1x8x8xf32> to vector<4x8x8xf32>
    %176 = arith.addf %171, %175 : vector<4x8x8xf32>
    %cst_64 = arith.constant dense<0xFF800000> : vector<4x8xf32>
    %177 = vector.multi_reduction <maximumf>, %176, %cst_64 [2] : vector<4x8x8xf32> to vector<4x8xf32>
    %178 = vector.shape_cast %177 : vector<4x8xf32> to vector<4x8x1xf32>
    %179 = vector.broadcast %178 : vector<4x8x1xf32> to vector<4x8x8xf32>
    %180 = arith.subf %176, %179 : vector<4x8x8xf32>
    %181 = math.exp %180 : vector<4x8x8xf32>
    %cst_65 = arith.constant dense<0.000000e+00> : vector<4x8xf32>
    %182 = vector.multi_reduction <add>, %181, %cst_65 [2] : vector<4x8x8xf32> to vector<4x8xf32>
    %183 = vector.shape_cast %182 : vector<4x8xf32> to vector<4x8x1xf32>
    %184 = vector.broadcast %183 : vector<4x8x1xf32> to vector<4x8x8xf32>
    %185 = arith.divf %181, %184 : vector<4x8x8xf32>
    "tpu.trace_start"() <{level = 10 : i32, message = "hnm,hmd->hnd"}> : () -> ()
    %cst_66 = arith.constant dense<0.000000e+00> : vector<4x8x8xf32>
    %186 = tpu.matmul %185, %170, %cst_66 {dimension_numbers = #tpu.dot_dimension_numbers<[2], [1], [1], [2], [0, 0, 0, 1, 1, 2], [0], [0]>} : vector<4x8x8xf32>, vector<4x8x8xf32>, vector<4x8x8xf32> -> vector<4x8x8xf32>
    "tpu.trace_stop"() : () -> ()
    %187 = vector.extract_strided_slice %186 {offsets = [0, 0, 0], sizes = [1, 8, 8], strides = [1, 1, 1]} : vector<4x8x8xf32> to vector<1x8x8xf32>
    %188 = vector.shape_cast %187 : vector<1x8x8xf32> to vector<8x8xf32>
    %189 = vector.extract_strided_slice %186 {offsets = [1, 0, 0], sizes = [1, 8, 8], strides = [1, 1, 1]} : vector<4x8x8xf32> to vector<1x8x8xf32>
    %190 = vector.shape_cast %189 : vector<1x8x8xf32> to vector<8x8xf32>
    %191 = vector.extract_strided_slice %186 {offsets = [2, 0, 0], sizes = [1, 8, 8], strides = [1, 1, 1]} : vector<4x8x8xf32> to vector<1x8x8xf32>
    %192 = vector.shape_cast %191 : vector<1x8x8xf32> to vector<8x8xf32>
    %193 = vector.extract_strided_slice %186 {offsets = [3, 0, 0], sizes = [1, 8, 8], strides = [1, 1, 1]} : vector<4x8x8xf32> to vector<1x8x8xf32>
    %194 = vector.shape_cast %193 : vector<1x8x8xf32> to vector<8x8xf32>
    %195 = tpu.concatenate %188, %190, %192, %194 in 1 : vector<8x8xf32>, vector<8x8xf32>, vector<8x8xf32>, vector<8x8xf32> -> vector<8x32xf32>
    %c1_67 = arith.constant 1 : index
    %c0_68 = arith.constant 0 : index
    %c0_69 = arith.constant 0 : index
    %196 = vector.load %arg3[%c1_67, %c0_68, %c0_69] : memref<2x33x32xf32, #tpu.memory_space<vmem>>, vector<1x33x32xf32>
    %197 = vector.shape_cast %196 : vector<1x33x32xf32> to vector<33x32xf32>
    %198 = vector.extract_strided_slice %197 {offsets = [0, 0], sizes = [32, 32], strides = [1, 1]} : vector<33x32xf32> to vector<32x32xf32>
    %cst_70 = arith.constant dense<0.000000e+00> : vector<8x32xf32>
    %199 = tpu.matmul %195, %198, %cst_70 {dimension_numbers = #tpu.dot_dimension_numbers<[1], [0], [0], [1], [0, 0, 1, 1], [], []>} : vector<8x32xf32>, vector<32x32xf32>, vector<8x32xf32> -> vector<8x32xf32>
    %200 = arith.addf %139, %199 : vector<8x32xf32>
    %201 = vector.extract_strided_slice %197 {offsets = [32, 0], sizes = [1, 32], strides = [1, 1]} : vector<33x32xf32> to vector<1x32xf32>
    %202 = vector.broadcast %201 : vector<1x32xf32> to vector<8x32xf32>
    %203 = arith.addf %200, %202 : vector<8x32xf32>
    %cst_71 = arith.constant dense<0.000000e+00> : vector<8xf32>
    %204 = vector.multi_reduction <add>, %203, %cst_71 [1] : vector<8x32xf32> to vector<8xf32>
    %205 = vector.shape_cast %204 : vector<8xf32> to vector<8x1xf32>
    %cst_72 = arith.constant 3.200000e+01 : f32
    %206 = vector.broadcast %cst_72 : f32 to vector<8x1xf32>
    %207 = arith.divf %205, %206 : vector<8x1xf32>
    %208 = vector.broadcast %207 : vector<8x1xf32> to vector<8x32xf32>
    %209 = arith.subf %203, %208 : vector<8x32xf32>
    %210 = arith.mulf %209, %209 : vector<8x32xf32>
    %cst_73 = arith.constant dense<0.000000e+00> : vector<8xf32>
    %211 = vector.multi_reduction <add>, %210, %cst_73 [1] : vector<8x32xf32> to vector<8xf32>
    %212 = vector.shape_cast %211 : vector<8xf32> to vector<8x1xf32>
    %cst_74 = arith.constant 3.200000e+01 : f32
    %213 = vector.broadcast %cst_74 : f32 to vector<8x1xf32>
    %214 = arith.divf %212, %213 : vector<8x1xf32>
    %215 = vector.broadcast %207 : vector<8x1xf32> to vector<8x32xf32>
    %216 = arith.subf %203, %215 : vector<8x32xf32>
    %cst_75 = arith.constant 9.99999974E-6 : f32
    %217 = vector.broadcast %cst_75 : f32 to vector<8x1xf32>
    %218 = arith.addf %214, %217 : vector<8x1xf32>
    %219 = math.rsqrt %218 : vector<8x1xf32>
    %220 = vector.broadcast %219 : vector<8x1xf32> to vector<8x32xf32>
    %221 = arith.mulf %216, %220 : vector<8x32xf32>
    %c1_76 = arith.constant 1 : index
    %c0_77 = arith.constant 0 : index
    %c0_78 = arith.constant 0 : index
    %222 = vector.load %arg4[%c1_76, %c0_77, %c0_78] : memref<2x33x128xf32, #tpu.memory_space<vmem>>, vector<1x33x128xf32>
    %223 = vector.shape_cast %222 : vector<1x33x128xf32> to vector<33x128xf32>
    %224 = vector.extract_strided_slice %223 {offsets = [0, 0], sizes = [32, 128], strides = [1, 1]} : vector<33x128xf32> to vector<32x128xf32>
    %cst_79 = arith.constant dense<0.000000e+00> : vector<8x128xf32>
    %225 = tpu.matmul %221, %224, %cst_79 {dimension_numbers = #tpu.dot_dimension_numbers<[1], [0], [0], [1], [0, 0, 1, 1], [], []>} : vector<8x32xf32>, vector<32x128xf32>, vector<8x128xf32> -> vector<8x128xf32>
    %226 = vector.extract_strided_slice %223 {offsets = [32, 0], sizes = [1, 128], strides = [1, 1]} : vector<33x128xf32> to vector<1x128xf32>
    %227 = vector.broadcast %226 : vector<1x128xf32> to vector<8x128xf32>
    %228 = arith.addf %225, %227 : vector<8x128xf32>
    %cst_80 = arith.constant 5.000000e-01 : f32
    %229 = vector.broadcast %cst_80 : f32 to vector<8x128xf32>
    %230 = arith.mulf %229, %228 : vector<8x128xf32>
    %cst_81 = arith.constant 0.707106769 : f32
    %231 = vector.broadcast %cst_81 : f32 to vector<8x128xf32>
    %232 = arith.mulf %228, %231 : vector<8x128xf32>
    %cst_82 = arith.constant 0.000000e+00 : f32
    %233 = vector.broadcast %cst_82 : f32 to vector<8x128xf32>
    %234 = arith.cmpf oge, %232, %233 : vector<8x128xf32>
    %cst_83 = arith.constant 1.000000e+00 : f32
    %cst_84 = arith.constant -1.000000e+00 : f32
    %235 = vector.broadcast %cst_83 : f32 to vector<8x128xf32>
    %236 = vector.broadcast %cst_84 : f32 to vector<8x128xf32>
    %237 = arith.select %234, %235, %236 : vector<8x128xi1>, vector<8x128xf32>
    %238 = math.absf %232 : vector<8x128xf32>
    %cst_85 = arith.constant 0.327591091 : f32
    %239 = vector.broadcast %cst_85 : f32 to vector<8x128xf32>
    %240 = arith.mulf %239, %238 : vector<8x128xf32>
    %cst_86 = arith.constant 1.000000e+00 : f32
    %241 = vector.broadcast %cst_86 : f32 to vector<8x128xf32>
    %242 = arith.addf %241, %240 : vector<8x128xf32>
    %cst_87 = arith.constant 1.000000e+00 : f32
    %243 = vector.broadcast %cst_87 : f32 to vector<8x128xf32>
    %244 = arith.divf %243, %242 : vector<8x128xf32>
    %cst_88 = arith.constant 1.06140542 : f32
    %245 = vector.broadcast %cst_88 : f32 to vector<8x128xf32>
    %246 = arith.mulf %245, %244 : vector<8x128xf32>
    %cst_89 = arith.constant -1.45315206 : f32
    %247 = vector.broadcast %cst_89 : f32 to vector<8x128xf32>
    %248 = arith.addf %246, %247 : vector<8x128xf32>
    %249 = arith.mulf %248, %244 : vector<8x128xf32>
    %cst_90 = arith.constant 1.42141378 : f32
    %250 = vector.broadcast %cst_90 : f32 to vector<8x128xf32>
    %251 = arith.addf %249, %250 : vector<8x128xf32>
    %252 = arith.mulf %251, %244 : vector<8x128xf32>
    %cst_91 = arith.constant -0.284496725 : f32
    %253 = vector.broadcast %cst_91 : f32 to vector<8x128xf32>
    %254 = arith.addf %252, %253 : vector<8x128xf32>
    %255 = arith.mulf %254, %244 : vector<8x128xf32>
    %cst_92 = arith.constant 0.254829586 : f32
    %256 = vector.broadcast %cst_92 : f32 to vector<8x128xf32>
    %257 = arith.addf %255, %256 : vector<8x128xf32>
    %258 = arith.mulf %257, %244 : vector<8x128xf32>
    %259 = arith.mulf %238, %238 : vector<8x128xf32>
    %cst_93 = arith.constant 0.000000e+00 : f32
    %260 = vector.broadcast %cst_93 : f32 to vector<8x128xf32>
    %261 = arith.subf %260, %259 : vector<8x128xf32>
    %262 = math.exp %261 : vector<8x128xf32>
    %263 = arith.mulf %258, %262 : vector<8x128xf32>
    %cst_94 = arith.constant 1.000000e+00 : f32
    %264 = vector.broadcast %cst_94 : f32 to vector<8x128xf32>
    %265 = arith.subf %264, %263 : vector<8x128xf32>
    %266 = arith.mulf %237, %265 : vector<8x128xf32>
    %cst_95 = arith.constant 1.000000e+00 : f32
    %267 = vector.broadcast %cst_95 : f32 to vector<8x128xf32>
    %268 = arith.addf %267, %266 : vector<8x128xf32>
    %269 = arith.mulf %230, %268 : vector<8x128xf32>
    %c1_96 = arith.constant 1 : index
    %c0_97 = arith.constant 0 : index
    %c0_98 = arith.constant 0 : index
    %270 = vector.load %arg5[%c1_96, %c0_97, %c0_98] : memref<2x129x32xf32, #tpu.memory_space<vmem>>, vector<1x129x32xf32>
    %271 = vector.shape_cast %270 : vector<1x129x32xf32> to vector<129x32xf32>
    %272 = vector.extract_strided_slice %271 {offsets = [0, 0], sizes = [128, 32], strides = [1, 1]} : vector<129x32xf32> to vector<128x32xf32>
    %cst_99 = arith.constant dense<0.000000e+00> : vector<8x32xf32>
    %273 = tpu.matmul %269, %272, %cst_99 {dimension_numbers = #tpu.dot_dimension_numbers<[1], [0], [0], [1], [0, 0, 1, 1], [], []>} : vector<8x128xf32>, vector<128x32xf32>, vector<8x32xf32> -> vector<8x32xf32>
    %274 = arith.addf %203, %273 : vector<8x32xf32>
    %275 = vector.extract_strided_slice %271 {offsets = [128, 0], sizes = [1, 32], strides = [1, 1]} : vector<129x32xf32> to vector<1x32xf32>
    %276 = vector.broadcast %275 : vector<1x32xf32> to vector<8x32xf32>
    %277 = arith.addf %274, %276 : vector<8x32xf32>
    %cst_100 = arith.constant dense<0.000000e+00> : vector<8xf32>
    %278 = vector.multi_reduction <add>, %277, %cst_100 [1] : vector<8x32xf32> to vector<8xf32>
    %279 = vector.shape_cast %278 : vector<8xf32> to vector<8x1xf32>
    %cst_101 = arith.constant 3.200000e+01 : f32
    %280 = vector.broadcast %cst_101 : f32 to vector<8x1xf32>
    %281 = arith.divf %279, %280 : vector<8x1xf32>
    %282 = vector.broadcast %281 : vector<8x1xf32> to vector<8x32xf32>
    %283 = arith.subf %277, %282 : vector<8x32xf32>
    %284 = arith.mulf %283, %283 : vector<8x32xf32>
    %cst_102 = arith.constant dense<0.000000e+00> : vector<8xf32>
    %285 = vector.multi_reduction <add>, %284, %cst_102 [1] : vector<8x32xf32> to vector<8xf32>
    %286 = vector.shape_cast %285 : vector<8xf32> to vector<8x1xf32>
    %cst_103 = arith.constant 3.200000e+01 : f32
    %287 = vector.broadcast %cst_103 : f32 to vector<8x1xf32>
    %288 = arith.divf %286, %287 : vector<8x1xf32>
    %289 = vector.broadcast %281 : vector<8x1xf32> to vector<8x32xf32>
    %290 = arith.subf %277, %289 : vector<8x32xf32>
    %cst_104 = arith.constant 9.99999974E-6 : f32
    %291 = vector.broadcast %cst_104 : f32 to vector<8x1xf32>
    %292 = arith.addf %288, %291 : vector<8x1xf32>
    %293 = math.rsqrt %292 : vector<8x1xf32>
    %294 = vector.broadcast %293 : vector<8x1xf32> to vector<8x32xf32>
    %295 = arith.mulf %290, %294 : vector<8x32xf32>
    %c0_105 = arith.constant 0 : index
    %c0_106 = arith.constant 0 : index
    %296 = vector.load %arg7[%c0_105, %c0_106] : memref<33x32xf32, #tpu.memory_space<vmem>>, vector<33x32xf32>
    %297 = vector.extract_strided_slice %296 {offsets = [0, 0], sizes = [32, 32], strides = [1, 1]} : vector<33x32xf32> to vector<32x32xf32>
    %cst_107 = arith.constant dense<0.000000e+00> : vector<8x32xf32>
    %298 = tpu.matmul %295, %297, %cst_107 {dimension_numbers = #tpu.dot_dimension_numbers<[1], [0], [0], [1], [0, 0, 1, 1], [], []>} : vector<8x32xf32>, vector<32x32xf32>, vector<8x32xf32> -> vector<8x32xf32>
    %299 = vector.extract_strided_slice %296 {offsets = [32, 0], sizes = [1, 32], strides = [1, 1]} : vector<33x32xf32> to vector<1x32xf32>
    %300 = vector.broadcast %299 : vector<1x32xf32> to vector<8x32xf32>
    %301 = arith.addf %298, %300 : vector<8x32xf32>
    %c0_108 = arith.constant 0 : index
    %c0_109 = arith.constant 0 : index
    %c0_110 = arith.constant 0 : index
    %302 = vector.load %arg8[%c0_108, %c0_109, %c0_110] : memref<1x8x32xf32, #tpu.memory_space<vmem>>, vector<1x8x32xf32>
    %303 = vector.shape_cast %302 : vector<1x8x32xf32> to vector<8x32xf32>
    %304 = vector.shape_cast %301 : vector<8x32xf32> to vector<1x8x32xf32>
    tpu.vector_store %arg8[%c0_108, %c0_109, %c0_110], %304 {strides = array<i32>} : memref<1x8x32xf32, #tpu.memory_space<vmem>>, vector<1x8x32xf32>,
    return
  }
  func.func @transform_0(%arg0: i32) -> (i32, i32, i32) {
    %c0_i32 = arith.constant 0 : i32
    %c0_i32_0 = arith.constant 0 : i32
    %c0_i32_1 = arith.constant 0 : i32
    return %arg0, %c0_i32, %c0_i32_0 : i32, i32, i32
  }
  func.func @transform_1(%arg0: i32) -> (i32, i32, i32, i32) {
    %c0_i32 = arith.constant 0 : i32
    %c0_i32_0 = arith.constant 0 : i32
    %c0_i32_1 = arith.constant 0 : i32
    %c0_i32_2 = arith.constant 0 : i32
    %c0_i32_3 = arith.constant 0 : i32
    return %c0_i32, %c0_i32_0, %c0_i32_1, %c0_i32_2 : i32, i32, i32, i32
  }
  func.func @transform_2(%arg0: i32) -> (i32, i32, i32) {
    %c0_i32 = arith.constant 0 : i32
    %c0_i32_0 = arith.constant 0 : i32
    %c0_i32_1 = arith.constant 0 : i32
    %c0_i32_2 = arith.constant 0 : i32
    return %c0_i32, %c0_i32_0, %c0_i32_1 : i32, i32, i32
  }
  func.func @transform_3(%arg0: i32) -> (i32, i32, i32) {
    %c0_i32 = arith.constant 0 : i32
    %c0_i32_0 = arith.constant 0 : i32
    %c0_i32_1 = arith.constant 0 : i32
    %c0_i32_2 = arith.constant 0 : i32
    return %c0_i32, %c0_i32_0, %c0_i32_1 : i32, i32, i32
  }
  func.func @transform_4(%arg0: i32) -> (i32, i32, i32) {
    %c0_i32 = arith.constant 0 : i32
    %c0_i32_0 = arith.constant 0 : i32
    %c0_i32_1 = arith.constant 0 : i32
    %c0_i32_2 = arith.constant 0 : i32
    return %c0_i32, %c0_i32_0, %c0_i32_1 : i32, i32, i32
  }
  func.func @transform_5(%arg0: i32) -> (i32, i32, i32) {
    %c0_i32 = arith.constant 0 : i32
    %c0_i32_0 = arith.constant 0 : i32
    %c0_i32_1 = arith.constant 0 : i32
    %c0_i32_2 = arith.constant 0 : i32
    return %c0_i32, %c0_i32_0, %c0_i32_1 : i32, i32, i32
  }
  func.func @transform_6(%arg0: i32) -> (i32, i32) {
    %c0_i32 = arith.constant 0 : i32
    %c0_i32_0 = arith.constant 0 : i32
    %c0_i32_1 = arith.constant 0 : i32
    return %c0_i32, %c0_i32_0 : i32, i32
  }
  func.func @transform_7(%arg0: i32) -> (i32, i32, i32) {
    %c0_i32 = arith.constant 0 : i32
    %c0_i32_0 = arith.constant 0 : i32
    %c0_i32_1 = arith.constant 0 : i32
    return %arg0, %c0_i32, %c0_i32_0 : i32, i32, i32
  }
}

</mosaic_0001>

<bundles_post_ra>
// kernel: tpu_custom_call.1
= control target key start
LH: loop header
LB: loop body
LE: loop exit
PB: predicated region body
PF: predicated region fallthrough
CT: control target
= control target key end

     0   :  { %12 = vsyncpa [#allocation3], 0  ;;  %s4594_s0 = inlined_call_operand.vmem [shape: f32[2,8,32], index: 0, kind: input, shape index: {}]   ;;  %s4595_s1 = inlined_call_operand.vmem [shape: f32[2,4,33,24], index: 1, kind: input, shape index: {}]   ;;  %s4596_s2 = inlined_call_operand.vmem [shape: f32[2,33,32], index: 2, kind: input, shape index: {}]   ;;  %s4597_s3 = inlined_call_operand.vmem [shape: f32[2,33,128], index: 3, kind: input, shape index: {}]   ;;  %s4598_s4 = inlined_call_operand.vmem [shape: f32[2,129,32], index: 4, kind: input, shape index: {}]   ;;  %s4599_s5 = inlined_call_operand.vmem [shape: f32[2,8,8], index: 5, kind: input, shape index: {}]   ;;  %s4600_s6 = inlined_call_operand.vmem [shape: f32[33,32], index: 6, kind: input, shape index: {}]   ;;  %s4601_s7 = inlined_call_operand.hbm [shape: f32[2,8,32], index: 7, kind: output, shape index: {}]  }
   0x1   :  { %14 = vsyncpa [#allocation3 + $0x1], 0  ;;  %s3932_s24 = smov 0   ;;  %s3934_s25 = smov 0  }
   0x2   :  { %s3936_s26 = smov 0   ;;  %s3938_s27 = smov 0  }
   0x3 LB: > { %s3953_s28 = sadd.s32 4294967295, %s3880_s27   ;;  %s3060_s29 = sadd.s32 4294967294, %s3880_s27   ;;  %s3880_s27 = sphi %s3938_s27, %s4607_s27   ;;  %s3876_s26 = sphi %s3936_s26, %s4606_s26   ;;  %s3872_s25 = sphi %s3934_s25, %s4605_s25   ;;  %s3868_s24 = sphi %s3932_s24, %s4604_s24  }
   0x4   : > { %s3957_s30 = sadd.s32 1, %s3880_s27   ;;  %s179_s8 = sadd.s32 1, %s3876_s26 }
   0x5   : > { %s176_s9 = ssub.s32 %s3880_s27, %s3957_s30  ;;  %p189_p0 = scmp.ne.s32.totalorder %s3876_s26, %s3872_s25 }
   0x6   : > { %p177_p1 = scmp.eq.s32.totalorder %s176_s9, 0  ;;  %p190_p2 = scmp.eq.s32.totalorder %s3953_s28, 1 }
   0x7   : > { %p195_p3 = scmp.ne.s32.totalorder %s3872_s25, %s3868_s24  ;;  %p196_p4 = scmp.eq.s32.totalorder %s3060_s29, 1 }
   0x8   : > { %s3968_s10 = scalar_select %p177_p1, %s3876_s26, %s179_s8  }
   0x9   : > { %p3970_p5 = por %p190_p2, %p189_p0  ;;  %p3974_p6 = por %p196_p4, %p195_p3 }
   0xa   : > { %p3063_p7 = scmp.ge.s32.totalorder %s3880_s27, 1  ;;  %p239_p8 = scmp.lt.s32.totalorder %s3880_s27, 3 }
   0xc   : > { %p240_p9 = pnand %p3063_p7, %p239_p8 }
   0xd   : > { %p270_p10 = scmp.lt.s32.totalorder (!%p240_p9), %s3953_s28, 1  ;;  %vm275_vm0 = vcmask (!%p240_p9), 261120   ;;  %v290_v7 = vld [vmem:[%s4595_s1] sm:$0xff] (!%p240_p9)  ;;  %v291_v8 = vld [vmem:[%s4595_s1 + $0x8] sm:$0xff] (!%p240_p9)  ;;  %v300_v9 = vld [vmem:[%s4595_s1 + $0x50] sm:$0xff] (!%p240_p9)  ;;  %v3882_v10 = vmov (!%p240_p9), 0.0|0.0  }
   0xe   : > { %243 = sbr.rel (%p240_p9) target bundleno = 5601 (0x15e1), region = 48  ;;  %3594 = vmatprep.subr.bf16.mxu1 (!%p240_p9), %v3882_v10  ;;  %v3595_v11 = vpack.c.bf16 (!%p240_p9), %v291_v8, %v290_v7  ;;  %3606 = vmatprep.subr.bf16.mxu0 (!%p240_p9), %v3882_v10  ;;  %v301_v12 = vld [vmem:[%s4595_s1 + $0x58] sm:$0xff] (!%p240_p9)  ;;  %v292_v13 = vld [vmem:[%s4595_s1 + $0x10] sm:$0xff] (!%p240_p9)  ;;  %v302_v16 = vld [vmem:[%s4595_s1 + $0x60] sm:$0xff] (!%p240_p9)  ;;  %vm3883_vm1 = vmmov (!%p240_p9), 0   ;;  %v3884_v18 = vmov (!%p240_p9), 0.0  }
   0xf   : > { %v293_v14 = vld [vmem:[%s4595_s1 + $0x18] sm:$0xff] (!%p240_p9)  ;;  %v3607_v15 = vpack.c.bf16 (!%p240_p9), %v301_v12, %v300_v9  ;;  %v303_v17 = vld [vmem:[%s4595_s1 + $0x68] sm:$0xff] (!%p240_p9)  ;;  %3309 = vmatprep.mubr.msk.f32.mxu1 (!%p240_p9), %vm3883_vm1, %v3884_v18  ;;  %3331 = vmatprep.mubr.msk.f32.mxu0 (!%p240_p9), %vm3883_vm1, %v3884_v18  ;;  %v296_v25 = vld [vmem:[%s4595_s1 + $0x30] sm:$0xff] (!%p240_p9)  ;;  %s3885_s9 = smov (!%p240_p9), 120   ;;  %vm613_vm2 = vcmask (!%p240_p9), 64512   ;;  %s3886_s19 = smov (!%p240_p9), 112  }
  0x10   : > { %3596 = vmatpush3.bf16.msra.mxu1 (!%p240_p9), %v3595_v11  ;;  %v3598_v19 = vpack.c.bf16 (!%p240_p9), %v293_v14, %v292_v13  ;;  %v3610_v20 = vpack.c.bf16 (!%p240_p9), %v303_v17, %v302_v16  ;;  %v295_v24 = vld [vmem:[%s4595_s1 + $0x28] sm:$0xff] (!%p240_p9)  ;;  %v297_v29 = vld [vmem:[%s4595_s1 + $0x38] sm:$0xff] (!%p240_p9)  ;;  %v298_v30 = vld [vmem:[%s4595_s1 + $0x40] sm:$0xff] (!%p240_p9)  ;;  %s3887_s15 = smov (!%p240_p9), 16   ;;  %s3888_s16 = smov (!%p240_p9), 8   ;;  %vm1280_vm3 = vcmask (!%p240_p9), 130048  }
  0x11   : > { %3608 = vmatpush3.bf16.msra.mxu0 (!%p240_p9), %v3607_v15  ;;  %3597 = vmatprep.subr.bf16.mxu1 (!%p240_p9), %v3882_v10  ;;  %v3601_v27 = vpack.c.bf16 (!%p240_p9), %v296_v25, %v295_v24  ;;  %v3604_v31 = vpack.c.bf16 (!%p240_p9), %v298_v30, %v297_v29  ;;  %v305_v32 = vld [vmem:[%s4595_s1 + $0x78] sm:$0xff] (!%p240_p9)  ;;  %v306_v33 = vld [vmem:[%s4595_s1 + $0x80] sm:$0xff] (!%p240_p9)  ;;  %v307_v35 = vld [vmem:[%s4595_s1 + $0x88] sm:$0xff] (!%p240_p9)  ;;  %vm1282_vm4 = vcmask (!%p240_p9), 195584   ;;  %s267_s21 = sand.u32 (!%p240_p9), 1, %s3872_s25  }
  0x12   : > { %3609 = vmatprep.subr.bf16.mxu0 (!%p240_p9), %v3882_v10  ;;  %v3613_v34 = vpack.c.bf16 (!%p240_p9), %v306_v33, %v305_v32  ;;  %v308_v36 = vld [vmem:[%s4595_s1 + $0x90] sm:$0xff] (!%p240_p9)  ;;  %v3066_v38 = vld [vmem:[%s4595_s1 + $0x20] ss:$0 sm:$0xff] (!%p240_p9)  ;;  %v3067_v46 = vld [vmem:[%s4595_s1 + $0x48] ss:$0 sm:$0xff] (!%p240_p9)  ;;  %s3064_s22 = sshll.u32 (!%p240_p9), %s267_s21, 3 }
  0x13   : > { %v3616_v37 = vpack.c.bf16 (!%p240_p9), %v308_v36, %v307_v35  ;;  %v3068_v39 = vld [vmem:[%s4595_s1 + $0x70] ss:$0 sm:$0xff] (!%p240_p9)  ;;  %v3069_v50 = vld [vmem:[%s4595_s1 + $0x98] ss:$0 sm:$0xff] (!%p240_p9)  ;;  %v609_v58 = vld [vmem:[%s4599_s5] sm:$0xff] (!%p240_p9)  ;;  %s269_s23 = scalar_lea.vmem (!%p240_p9), [#allocation2], %s3064_s22 }
  0x14   : > { %3599 = vmatpush3.bf16.msra.mxu1 (!%p240_p9), %v3598_v19 }
  0x15   : > { %s271_s13 = scalar_select %p270_p10, %s3953_s28, 1  ;;  %3611 = vmatpush3.bf16.msra.mxu0 %v3610_v20  ;;  %3600 = vmatprep.subr.bf16.mxu1 %v3882_v10 }
  0x16   : > { %3355 = vmatprep.subr.mxu0 %v3884_v18 }
  0x17   : > { %s3065_s14 = sshll.u32 %s271_s13, 3  ;;  %s2988_s13 = scalar_lea.sflag [#allocation3], %s267_s21 }
  0x18   : > { %s273_s17 = scalar_lea.vmem %s4594_s0, %s3065_s14 }
  0x19   : > { %v3985_v0 = vld [vmem:[%s273_s17] sm:$0xff]  ;;  %s3889_s17 = smov 24  }
  0x1a   : > { %v276_v1 = vsel %vm275_vm0, %v3985_v0, 0.0 }
  0x1b   : > { %277 = vadd.xlane.f32.xlu0 %v276_v1 }
  0xa8   : > { %v278_v2 = vpop.xlane.xlu0 %277 }
  0xa9   : > { %v280_v3 = vmul.f32 0.03125, %v278_v2 }
  0xab   : > { %v281_v4 = vsub.f32 %v3985_v0, %v280_v3 }
  0xad   : > { %v282_v5 = vmul.f32 %v281_v4, %v281_v4 }
  0xaf   : > { %v283_v6 = vsel %vm275_vm0, %v282_v5, 0.0 }
  0xb0   : > { %284 = vadd.xlane.f32.xlu0 %v283_v6 }
 0x13d   : > { %v285_v21 = vpop.xlane.xlu0 %284 }
 0x13e   : > { %v286_v22 = vmul.f32 0.03125, %v285_v21 }
 0x140   : > { %v287_v23 = vadd.f32 1e-05, %v286_v22 }
 0x142   : > { %3768 = vrsqrt.f32 %v287_v23 }
 0x14c   : > { %v3769_v26 = vpop.eup %3768 }
 0x14d   : > { %v289_v28 = vmul.f32 %v3769_v26, %v281_v4 }
 0x14f   : > { %3310 = vmatmul.mubr.msk.f32.vlgmr.msra.gmra.mrb[0].mxu1 %vm275_vm0, %v289_v28  ;;  %3332 = vmatmul.mubr.msk.f32.vlgmr.msra.gmra.mrb[0].mxu0 %vm275_vm0, %v289_v28 }
 0x150   : > { %3602 = vmatpush3.bf16.msra.mxu1 %v3601_v27  ;;  %3320 = vmatprep.mubr.msk.f32.mxu1 %vm3883_vm1, %v3884_v18 }
 0x151   : > { %3603 = vmatprep.subr.bf16.mxu1 %v3882_v10  ;;  %3357 = vmatprep.mubr.msk.f32.mxu0 %vm3883_vm1, %v3884_v18 }
 0x154   : > { %3605 = vmatpush3.bf16.msra.mxu1 %v3604_v31 }
 0x155   : > { %3612 = vmatprep.subr.bf16.mxu1 %v3882_v10 }
 0x157   : > { %3321 = vmatmul.mubr.msk.f32.vlgmr.msra.gmra.mrb[2].mxu1 %vm275_vm0, %v289_v28 }
 0x158   : > { %3614 = vmatpush3.bf16.msra.mxu1 %v3613_v34  ;;  %3342 = vmatprep.mubr.msk.f32.mxu1 %vm3883_vm1, %v3884_v18 }
 0x159   : > { %3615 = vmatprep.subr.bf16.mxu1 %v3882_v10 }
 0x15c   : > { %3617 = vmatpush3.bf16.msra.mxu1 %v3616_v37 }
 0x15d   : > { %3345 = vmatprep.subr.mxu1 %v3884_v18 }
 0x15f   : > { %3343 = vmatmul.mubr.msk.f32.vlgmr.msra.gmra.mrb[4].mxu1 %vm275_vm0, %v289_v28 }
 0x160   : > { %3347 = vmatprep.mubr.msk.f32.mxu1 %vm3883_vm1, %v3884_v18 }
 0x222   : > { %v395_v40 = vpop.f32.mrb[0].mxu1  ;;  %v535_v41 = vpop.f32.mrb[0].mxu0 }
 0x223   : > { %v396_v42 = vadd.f32 %v3066_v38, %v395_v40  ;;  %v4071_v43 = vadd.f32 %v3068_v39, %v535_v41  ;;  %v3311_v44 = vpop.f32.mrb[1].mxu1  ;;  %v3333_v45 = vpop.f32.mrb[1].mxu0 }
 0x225   : > { %766 = vrot.lane.b32.xlu0 %v4071_v43, %s3885_s9  ;;  %611 = vrot.lane.b32.xlu1 %v396_v42, %s3885_s9 }
 0x22a   : > { %v465_v47 = vpop.f32.mrb[2].mxu1 }
 0x22b   : > { %v466_v48 = vadd.f32 %v3067_v46, %v465_v47  ;;  %v3322_v49 = vpop.f32.mrb[3].mxu1 }
 0x22d   : > { %689 = vrot.lane.b32.xlu1 %v466_v48, %s3885_s9 }
 0x232   : > { %v605_v51 = vpop.f32.mrb[4].mxu1 }
 0x233   : > { %v4083_v52 = vadd.f32 %v3069_v50, %v605_v51  ;;  %v3344_v53 = vpop.f32.mrb[5].mxu1  ;;  %v1284_v50 = vld [vmem:[%s4596_s2] sm:$0xff]  ;;  %v1285_v51 = vld [vmem:[%s4596_s2 + $0x8] sm:$0xff] }
 0x234   : > { %v3619_v53 = vpack.c.bf16 %v1285_v51, %v1284_v50  ;;  %v1504_v51 = vld [vmem:[%s4598_s4 + $0x70] sm:$0xff] }
 0x235   : > { %843 = vrot.lane.b32.xlu1 %v4083_v52, %s3885_s9 }
 0x297   : > { %v767_v54 = vpop.permute.xlu0 %766  ;;  %v612_v55 = vpop.permute.xlu1 %611 }
 0x298   : > { %3346 = vmatpush3.xpose.msk.msra.mxu1 %vm613_vm2, %v612_v55  ;;  %3356 = vmatpush3.xpose.msk.msra.mxu0 %vm613_vm2, %v767_v54  ;;  %v1287_v54 = vld [vmem:[%s4596_s2 + $0x18] sm:$0xff] }
 0x299   : > { %3350 = vmatprep.subr.mxu1 %v3884_v18  ;;  %3365 = vmatprep.subr.mxu0 %v3884_v18 }
 0x29b   : > { %3348 = vmatmul.mubr.msk.f32.vlgmr.msra.gmra.mrb[6].mxu1 %vm613_vm2, %v396_v42  ;;  %3358 = vmatmul.mubr.msk.f32.vlgmr.msra.gmra.mrb[2].mxu0 %vm613_vm2, %v4071_v43 }
 0x29c   : > { %3352 = vmatprep.mubr.msk.f32.mxu1 %vm3883_vm1, %v3884_v18  ;;  %3367 = vmatprep.mubr.msk.f32.mxu0 %vm3883_vm1, %v3884_v18 }
 0x29f   : > { %v690_v56 = vpop.permute.xlu1 %689 }
 0x2a0   : > { %3351 = vmatpush3.xpose.msk.msra.mxu1 %vm613_vm2, %v690_v56 }
 0x2a1   : > { %3360 = vmatprep.subr.mxu1 %v3884_v18 }
 0x2a3   : > { %3353 = vmatmul.mubr.msk.f32.vlgmr.msra.gmra.mrb[8].mxu1 %vm613_vm2, %v466_v48 }
 0x2a4   : > { %3362 = vmatprep.mubr.msk.f32.mxu1 %vm3883_vm1, %v3884_v18 }
 0x2a7   : > { %v844_v57 = vpop.permute.xlu1 %843 }
 0x2a8   : > { %3361 = vmatpush3.xpose.msk.msra.mxu1 %vm613_vm2, %v844_v57 }
 0x2a9   : > { %3370 = vmatprep.subr.mxu1 %v3884_v18 }
 0x2ab   : > { %3363 = vmatmul.mubr.msk.f32.vlgmr.msra.gmra.mrb[10].mxu1 %vm613_vm2, %v4083_v52 }
 0x2ac   : > { %3372 = vmatprep.mubr.msk.f32.mxu1 %vm3883_vm1, %v3884_v18 }
 0x36e   : > { %v684_v59 = vpop.f32.mrb[6].mxu1  ;;  %v838_v60 = vpop.f32.mrb[2].mxu0 }
 0x36f   : > { %v685_v61 = vadd.f32 %v684_v59, %v609_v58  ;;  %v3349_v62 = vpop.f32.mrb[7].mxu1  ;;  %v3359_v63 = vpop.f32.mrb[3].mxu0  ;;  %v839_v1 = vadd.f32 %v838_v60, %v609_v58 }
 0x371   : > { %v919_v2 = vsel %vm613_vm2, %v685_v61, -inf  ;;  %v925_v3 = vsel %vm613_vm2, %v839_v1, -inf }
 0x372   : > { %920 = vmax.xlane.f32.xlu1 %v919_v2 }
 0x376   : > { %v761_v4 = vpop.f32.mrb[8].mxu1  ;;  %926 = vmax.xlane.f32.xlu1 %v925_v3 }
 0x377   : > { %v762_v5 = vadd.f32 %v761_v4, %v609_v58  ;;  %v3354_v6 = vpop.f32.mrb[9].mxu1 }
 0x379   : > { %v922_v7 = vsel %vm613_vm2, %v762_v5, -inf }
 0x37a   : > { %923 = vmax.xlane.f32.xlu0 %v922_v7  ;;  %v3087_v7 = vld [vmem:[%s4596_s2 + $0x20] ss:$0 sm:$0xff] }
 0x37e   : > { %v915_v8 = vpop.f32.mrb[10].mxu1 }
 0x37f   : > { %v916_v9 = vadd.f32 %v915_v8, %v609_v58  ;;  %v3364_v11 = vpop.f32.mrb[11].mxu1 }
 0x381   : > { %v928_v12 = vsel %vm613_vm2, %v916_v9, -inf }
 0x382   : > { %929 = vmax.xlane.f32.xlu1 %v928_v12 }
 0x390   : > { %963 = vrot.lane.b32.xlu0 %v396_v42, %s3886_s19 }
 0x393   : > { %1039 = vrot.lane.b32.xlu1 %v466_v48, %s3886_s19 }
 0x3ff   : > { %v921_v13 = vpop.xlane.xlu1 %920 }
 0x400   : > { %v931_v14 = vsub.f32 %v685_v61, %v921_v13 }
 0x402   : > { %v935_v15 = vmul.f32 1.442695, %v931_v14 }
 0x403   : > { %v927_v16 = vpop.xlane.xlu1 %926 }
 0x404   : > { %3770 = vpow2.f32 %v935_v15  ;;  %v933_v17 = vsub.f32 %v839_v1, %v927_v16 }
 0x406   : > { %v939_v19 = vmul.f32 1.442695, %v933_v17 }
 0x407   : > { %v924_v20 = vpop.xlane.xlu0 %923 }
 0x408   : > { %3772 = vpow2.f32 %v939_v19  ;;  %v932_v21 = vsub.f32 %v762_v5, %v924_v20  ;;  %v1381_v20 = vld [vmem:[%s4597_s3] sm:$0xff] }
 0x40a   : > { %v937_v22 = vmul.f32 1.442695, %v932_v21  ;;  %v1383_v21 = vld [vmem:[%s4597_s3 + $0x10] sm:$0xff] }
 0x40b   : > { %v964_v23 = vpop.permute.xlu0 %963 }
 0x40c   : > { %3774 = vpow2.f32 %v937_v22  ;;  %3366 = vmatpush3.msra.mxu0 %v964_v23  ;;  %v1384_v23 = vld [vmem:[%s4597_s3 + $0x18] sm:$0xff] }
 0x40d   : > { %3375 = vmatprep.subr.mxu0 %v3884_v18 }
 0x40e   : > { %v3771_v24 = vpop.eup %3770 }
 0x40f   : > { %v930_v25 = vpop.xlane.xlu1 %929  ;;  %v943_v26 = vsel %vm613_vm2, %v3771_v24, 0.0 }
 0x410   : > { %v934_v27 = vsub.f32 %v916_v9, %v930_v25  ;;  %944 = vadd.xlane.f32.xlu1 %v943_v26 }
 0x412   : > { %v3773_v28 = vpop.eup %3772  ;;  %v941_v29 = vmul.f32 1.442695, %v934_v27 }
 0x413   : > { %v1040_v30 = vpop.permute.xlu1 %1039  ;;  %v949_v31 = vsel %vm613_vm2, %v3773_v28, 0.0 }
 0x414   : > { %3776 = vpow2.f32 %v941_v29  ;;  %3371 = vmatpush3.msra.mxu1 %v1040_v30  ;;  %950 = vadd.xlane.f32.xlu0 %v949_v31  ;;  %v1490_v30 = vld [vmem:[%s4598_s4] sm:$0xff]  ;;  %v1491_v31 = vld [vmem:[%s4598_s4 + $0x8] sm:$0xff] }
 0x415   : > { %3380 = vmatprep.subr.mxu1 %v3884_v18 }
 0x416   : > { %v3775_v32 = vpop.eup %3774 }
 0x417   : > { %v946_v33 = vsel %vm613_vm2, %v3775_v32, 0.0 }
 0x418   : > { %947 = vadd.xlane.f32.xlu1 %v946_v33  ;;  %v1492_v33 = vld [vmem:[%s4598_s4 + $0x10] sm:$0xff] }
 0x41e   : > { %v3777_v34 = vpop.eup %3776 }
 0x41f   : > { %v952_v35 = vsel %vm613_vm2, %v3777_v34, 0.0 }
 0x420   : > { %953 = vadd.xlane.f32.xlu1 %v952_v35 }
 0x42a   : > { %1191 = vrot.lane.b32.xlu0 %v4083_v52, %s3886_s19  ;;  %v1286_v52 = vld [vmem:[%s4596_s2 + $0x10] sm:$0xff] }
 0x42b   : > { %v3622_v55 = vpack.c.bf16 %v1287_v54, %v1286_v52  ;;  %v1505_v52 = vld [vmem:[%s4598_s4 + $0x78] sm:$0xff]  ;;  %v3088_v54 = vld [vmem:[%s4597_s3 + $0x20] ss:$0 sm:$0xff] }
 0x431   : > { %1115 = vrot.lane.b32.xlu1 %v4071_v43, %s3886_s19 }
 0x49d   : > { %v945_v36 = vpop.xlane.xlu1 %944 }
 0x49e   : > { %3778 = vrcp.f32 %v945_v36  ;;  %v1494_v36 = vld [vmem:[%s4598_s4 + $0x20] sm:$0xff] }
 0x4a1   : > { %v951_v37 = vpop.xlane.xlu0 %950 }
 0x4a2   : > { %3780 = vrcp.f32 %v951_v37  ;;  %v1495_v37 = vld [vmem:[%s4598_s4 + $0x28] sm:$0xff] }
 0x4a5   : > { %v948_v38 = vpop.xlane.xlu1 %947  ;;  %v1192_v47 = vpop.permute.xlu0 %1191 }
 0x4a6   : > { %3782 = vrcp.f32 %v948_v38  ;;  %v3637_v38 = vpack.c.bf16 %v1495_v37, %v1494_v36  ;;  %v3094_v37 = vld [vmem:[%s4595_s1 + $0xb8] sm:$0xff] }
 0x4a8   : > { %v3779_v39 = vpop.eup %3778 }
 0x4a9   : > { %v956_v40 = vmul.f32 %v3779_v39, %v3771_v24  ;;  %v3628_v24 = vpack.c.bf16 %v1384_v23, %v1383_v21  ;;  %v1496_v39 = vld [vmem:[%s4598_s4 + $0x30] sm:$0xff]  ;;  %v3090_v23 = vld [vmem:[%s4598_s4 + $0x80] ss:$0 sm:$0xff] }
 0x4ab   : > { %3368 = vmatmul.mubr.msk.f32.vlgmr.msra.gmra.mrb[4].mxu0 %vm613_vm2, %v956_v40  ;;  %v1497_v40 = vld [vmem:[%s4598_s4 + $0x38] sm:$0xff] }
 0x4ac   : > { %3377 = vmatprep.mubr.msk.f32.mxu0 %vm3883_vm1, %v3884_v18  ;;  %v3781_v42 = vpop.eup %3780 }
 0x4ad   : > { %v954_v41 = vpop.xlane.xlu1 %953  ;;  %v960_v45 = vmul.f32 %v3781_v42, %v3773_v28  ;;  %v1498_v42 = vld [vmem:[%s4598_s4 + $0x40] sm:$0xff] }
 0x4ae   : > { %3784 = vrcp.f32 %v954_v41  ;;  %v3640_v41 = vpack.c.bf16 %v1497_v40, %v1496_v39 }
 0x4b0   : > { %v3783_v44 = vpop.eup %3782 }
 0x4b1   : > { %v958_v46 = vmul.f32 %v3783_v44, %v3775_v32  ;;  %v1116_v43 = vpop.permute.xlu1 %1115  ;;  %v3631_v32 = vpack.c.bf16 %v1491_v31, %v1490_v30  ;;  %v1499_v44 = vld [vmem:[%s4598_s4 + $0x48] sm:$0xff] }
 0x4b2   : > { %3376 = vmatpush3.msra.mxu0 %v1116_v43  ;;  %v1501_v43 = vld [vmem:[%s4598_s4 + $0x58] sm:$0xff] }
 0x4b3   : > { %3373 = vmatmul.mubr.msk.f32.vlgmr.msra.gmra.mrb[12].mxu1 %vm613_vm2, %v958_v46  ;;  %3378 = vmatmul.mubr.msk.f32.vlgmr.msra.gmra.mrb[6].mxu0 %vm613_vm2, %v960_v45  ;;  %v3643_v45 = vpack.c.bf16 %v1499_v44, %v1498_v42  ;;  %v1500_v46 = vld [vmem:[%s4598_s4 + $0x50] sm:$0xff]  ;;  %v3096_v42 = vld [vmem:[%s4595_s1 + $0xc8] sm:$0xff] }
 0x4b4   : > { %3381 = vmatpush3.msra.mxu1 %v1192_v47  ;;  %3382 = vmatprep.mubr.msk.f32.mxu1 %vm3883_vm1, %v3884_v18  ;;  %v3646_v47 = vpack.c.bf16 %v1501_v43, %v1500_v46  ;;  %v3097_v44 = vld [vmem:[%s4595_s1 + $0xd0] sm:$0xff] }
 0x4b5   : > { %3618 = vmatprep.subr.bf16.mxu0 %v3882_v10  ;;  %3393 = vmatprep.mubr.msk.f32.mxu0 %vm3883_vm1, %v3884_v18  ;;  %v3661_v46 = vpack.c.bf16 %v3097_v44, %v3096_v42 }
 0x4b6   : > { %3624 = vmatprep.subr.bf16.mxu1 %v3882_v10  ;;  %3620 = vmatpush3.bf16.msra.mxu0 %v3619_v53  ;;  %v3652_v53 = vpack.c.bf16 %v1505_v52, %v1504_v51  ;;  %v3102_v51 = vld [vmem:[%s4595_s1 + $0xf8] sm:$0xff] }
 0x4b7   : > { %3621 = vmatprep.subr.bf16.mxu0 %v3882_v10 }
 0x4b8   : > { %v3785_v48 = vpop.eup %3784 }
 0x4b9   : > { %v962_v49 = vmul.f32 %v3785_v48, %v3777_v34  ;;  %v1493_v34 = vld [vmem:[%s4598_s4 + $0x18] sm:$0xff]  ;;  %v1502_v48 = vld [vmem:[%s4598_s4 + $0x60] sm:$0xff] }
 0x4ba   : > { %3623 = vmatpush3.bf16.msra.mxu0 %v3622_v55  ;;  %v3634_v35 = vpack.c.bf16 %v1493_v34, %v1492_v33  ;;  %v3091_v34 = vld [vmem:[%s4595_s1 + $0xa0] sm:$0xff] }
 0x4bb   : > { %3383 = vmatmul.mubr.msk.f32.vlgmr.msra.gmra.mrb[14].mxu1 %vm613_vm2, %v962_v49  ;;  %3630 = vmatprep.subr.bf16.mxu0 %v3882_v10  ;;  %v1503_v49 = vld [vmem:[%s4598_s4 + $0x68] sm:$0xff] }
 0x4bc   : > { %3404 = vmatprep.mubr.msk.f32.mxu1 %vm3883_vm1, %v3884_v18  ;;  %v3649_v50 = vpack.c.bf16 %v1503_v49, %v1502_v48  ;;  %v3099_v48 = vld [vmem:[%s4595_s1 + $0xe0] sm:$0xff] }
 0x57e   : > { %v1035_v56 = vpop.f32.mrb[4].mxu0 }
 0x57f   : > { %v3369_v57 = vpop.f32.mrb[5].mxu0 }
 0x586   : > { %v1111_v58 = vpop.f32.mrb[12].mxu1  ;;  %v1187_v59 = vpop.f32.mrb[6].mxu0 }
 0x587   : > { %1272 = vrot.lane.b32.xlu0 %v1187_v59, %s3887_s15  ;;  %v3379_v60 = vpop.f32.mrb[7].mxu0  ;;  %1268 = vrot.lane.b32.xlu1 %v1111_v58, %s3888_s16  ;;  %v3374_v61 = vpop.f32.mrb[13].mxu1 }
 0x58e   : > { %v1263_v62 = vpop.f32.mrb[14].mxu1 }
 0x58f   : > { %1276 = vrot.lane.b32.xlu1 %v1263_v62, %s3889_s17  ;;  %v3384_v63 = vpop.f32.mrb[15].mxu1 }
 0x5f9   : > { %v1269_v1 = vpop.permute.xlu1 %1268  ;;  %v1273_v2 = vpop.permute.xlu0 %1272 }
 0x5fa   : > { %v1279_v3 = vsel %vm613_vm2, %v1035_v56, %v1269_v1 }
 0x5fb   : > { %v1281_v4 = vsel %vm1280_vm3, %v1279_v3, %v1273_v2 }
 0x601   : > { %v1277_v5 = vpop.permute.xlu1 %1276 }
 0x602   : > { %v1283_v6 = vsel %vm1282_vm4, %v1281_v4, %v1277_v5 }
 0x603   : > { %3394 = vmatmul.mubr.msk.f32.vlgmr.msra.gmra.mrb[8].mxu0 %vm275_vm0, %v1283_v6 }
 0x604   : > { %3439 = vmatprep.mubr.msk.f32.mxu0 %vm3883_vm1, %v3884_v18  ;;  %3632 = vmatpush3.bf16.msra.mxu0 %v3631_v32 }
 0x605   : > { %3633 = vmatprep.subr.bf16.mxu0 %v3882_v10 }
 0x608   : > { %3635 = vmatpush3.bf16.msra.mxu0 %v3634_v35  ;;  %v3093_v35 = vld [vmem:[%s4595_s1 + $0xb0] sm:$0xff] }
 0x609   : > { %3636 = vmatprep.subr.bf16.mxu0 %v3882_v10 }
 0x60c   : > { %3638 = vmatpush3.bf16.msra.mxu0 %v3637_v38  ;;  %v3658_v38 = vpack.c.bf16 %v3094_v37, %v3093_v35 }
 0x60d   : > { %3639 = vmatprep.subr.bf16.mxu0 %v3882_v10 }
 0x610   : > { %3641 = vmatpush3.bf16.msra.mxu0 %v3640_v41 }
 0x611   : > { %3642 = vmatprep.subr.bf16.mxu0 %v3882_v10 }
 0x614   : > { %3644 = vmatpush3.bf16.msra.mxu0 %v3643_v45 }
 0x615   : > { %3645 = vmatprep.subr.bf16.mxu0 %v3882_v10 }
 0x618   : > { %3647 = vmatpush3.bf16.msra.mxu0 %v3646_v47  ;;  %v3098_v47 = vld [vmem:[%s4595_s1 + $0xd8] sm:$0xff] }
 0x619   : > { %3648 = vmatprep.subr.bf16.mxu0 %v3882_v10  ;;  %v3664_v49 = vpack.c.bf16 %v3099_v48, %v3098_v47 }
 0x61c   : > { %3650 = vmatpush3.bf16.msra.mxu0 %v3649_v50  ;;  %v3101_v50 = vld [vmem:[%s4595_s1 + $0xf0] sm:$0xff] }
 0x61d   : > { %3651 = vmatprep.subr.bf16.mxu0 %v3882_v10  ;;  %v3667_v52 = vpack.c.bf16 %v3102_v51, %v3101_v50 }
 0x620   : > { %3653 = vmatpush3.bf16.msra.mxu0 %v3652_v53  ;;  %v3103_v53 = vld [vmem:[%s4595_s1 + $0x100] sm:$0xff] }
 0x621   : > { %3486 = vmatprep.subr.mxu0 %v3884_v18 }
 0x6d6   : > { %v1358_v8 = vpop.f32.mrb[8].mxu0 }
 0x6d7   : > { %v1362_v9 = vadd.f32 %v1358_v8, %v3985_v0  ;;  %v3395_v11 = vpop.f32.mrb[9].mxu0  ;;  %v1382_v0 = vld [vmem:[%s4597_s3 + $0x8] sm:$0xff] }
 0x6d8   : > { %v3625_v22 = vpack.c.bf16 %v1382_v0, %v1381_v20 }
 0x6d9   : > { %v4169_v12 = vadd.f32 %v3087_v7, %v1362_v9 }
 0x6da   : > { %3626 = vmatpush3.bf16.msra.mxu1 %v3625_v22 }
 0x6db   : > { %v1368_v13 = vsel %vm275_vm0, %v4169_v12, 0.0  ;;  %3627 = vmatprep.subr.bf16.mxu1 %v3882_v10 }
 0x6dc   : > { %1369 = vadd.xlane.f32.xlu0 %v1368_v13 }
 0x6de   : > { %3629 = vmatpush3.bf16.msra.mxu1 %v3628_v24 }
 0x6df   : > { %3654 = vmatprep.subr.bf16.mxu1 %v3882_v10 }
 0x769   : > { %v1370_v14 = vpop.xlane.xlu0 %1369 }
 0x76a   : > { %v1371_v15 = vmul.f32 0.03125, %v1370_v14 }
 0x76c   : > { %v1372_v16 = vsub.f32 %v4169_v12, %v1371_v15 }
 0x76e   : > { %v1373_v17 = vmul.f32 %v1372_v16, %v1372_v16 }
 0x770   : > { %v1374_v19 = vsel %vm275_vm0, %v1373_v17, 0.0  ;;  %v3890_v17 = vmov -1.0  }
 0x771   : > { %1375 = vadd.xlane.f32.xlu1 %v1374_v19 }
 0x7fe   : > { %v1376_v25 = vpop.xlane.xlu1 %1375 }
 0x7ff   : > { %v1377_v26 = vmul.f32 0.03125, %v1376_v25 }
 0x801   : > { %v1378_v27 = vadd.f32 1e-05, %v1377_v26 }
 0x803   : > { %3786 = vrsqrt.f32 %v1378_v27 }
 0x80d   : > { %v3787_v28 = vpop.eup %3786 }
 0x80e   : > { %v1380_v29 = vmul.f32 %v3787_v28, %v1372_v16 }
 0x810   : > { %3405 = vmatmul.mubr.msk.f32.vlgmr.msra.gmra.mrb[16].mxu1 %vm275_vm0, %v1380_v29 }
 0x811   : > { %3450 = vmatprep.mubr.msk.f32.mxu1 %vm3883_vm1, %v3884_v18 }
 0x8e3   : > { %v1459_v55 = vpop.f32.mrb[16].mxu1 }
 0x8e4   : > { %v1460_v56 = vadd.f32 %v3088_v54, %v1459_v55  ;;  %v3406_v57 = vpop.f32.mrb[17].mxu1  ;;  %v3104_v54 = vld [vmem:[%s4595_s1 + $0x108] sm:$0xff] }
 0x8e5   : > { %v3670_v55 = vpack.c.bf16 %v3104_v54, %v3103_v53  ;;  %v3107_v57 = vld [vmem:[%s4595_s1 + $0x120] sm:$0xff] }
 0x8e6   : > { %v1464_v58 = vmul.f32 0.70710677, %v1460_v56  ;;  %v1463_v0 = vmul.f32 0.5, %v1460_v56  ;;  %v3106_v56 = vld [vmem:[%s4595_s1 + $0x118] sm:$0xff] }
 0x8e8   : > { %v1467_v59 = vand.u32 2147483647, %v1464_v58  ;;  %vm1465_vm5 = vcmp.ge.f32.partialorder %v1464_v58, 0.0  ;;  %v3673_v58 = vpack.c.bf16 %v3107_v57, %v3106_v56 }
 0x8e9   : > { %v1466_v19 = vsel %vm1465_vm5, 1.0, %v3890_v17 }
 0x8ea   : > { %v1468_v60 = vmul.f32 0.3275911, %v1467_v59  ;;  %v1481_v62 = vmul.f32 %v1467_v59, %v1467_v59  ;;  %v3108_v59 = vld [vmem:[%s4595_s1 + $0x128] sm:$0xff] }
 0x8ec   : > { %v1469_v61 = vadd.f32 1.0, %v1468_v60  ;;  %v1482_v1 = vsub.f32 0.0, %v1481_v62  ;;  %v3109_v60 = vld [vmem:[%s4595_s1 + $0x130] sm:$0xff]  ;;  %v3111_v62 = vld [vmem:[%s4595_s1 + $0xc0] ss:$0 sm:$0xff] }
 0x8ee   : > { %3788 = vrcp.f32 %v1469_v61  ;;  %v1483_v4 = vmul.f32 1.442695, %v1482_v1  ;;  %v3676_v61 = vpack.c.bf16 %v3109_v60, %v3108_v59 }
 0x8f0   : > { %3790 = vpow2.f32 %v1483_v4 }
 0x8f8   : > { %v3789_v63 = vpop.eup %3788 }
 0x8f9   : > { %v1472_v2 = vmul.f32 1.0614054, %v3789_v63 }
 0x8fa   : > { %v3791_v14 = vpop.eup %3790 }
 0x8fb   : > { %v1473_v3 = vadd.f32 -1.4531521, %v1472_v2 }
 0x8fd   : > { %v1474_v5 = vmul.f32 %v3789_v63, %v1473_v3  ;;  %v3112_v3 = vld [vmem:[%s4595_s1 + $0xe8] ss:$0 sm:$0xff] }
 0x8ff   : > { %v1475_v6 = vadd.f32 1.4214138, %v1474_v5 }
 0x901   : > { %v1476_v7 = vmul.f32 %v3789_v63, %v1475_v6 }
 0x903   : > { %v1477_v8 = vadd.f32 -0.28449672, %v1476_v7  ;;  %v3113_v7 = vld [vmem:[%s4595_s1 + $0x110] ss:$0 sm:$0xff] }
 0x905   : > { %v1478_v9 = vmul.f32 %v3789_v63, %v1477_v8 }
 0x907   : > { %v1479_v11 = vadd.f32 0.2548296, %v1478_v9 }
 0x909   : > { %v1480_v13 = vmul.f32 %v3789_v63, %v1479_v11 }
 0x90b   : > { %v1485_v15 = vmul.f32 %v3791_v14, %v1480_v13  ;;  %v3114_v13 = vld [vmem:[%s4595_s1 + $0x138] ss:$0 sm:$0xff] }
 0x90d   : > { %v1486_v16 = vsub.f32 1.0, %v1485_v15 }
 0x90f   : > { %v1487_v20 = vmul.f32 %v1486_v16, %v1466_v19 }
 0x911   : > { %v1488_v21 = vadd.f32 1.0, %v1487_v20 }
 0x913   : > { %v1489_v22 = vmul.f32 %v1488_v21, %v1463_v0 }
 0x915   : > { %3440 = vmatmul.mubr.f32.vlgmr.msra.gmra.mrb[10].mxu0 %v1489_v22  ;;  %v3119_v22 = vld [vmem:[%s4599_s5 + $0x8] sm:$0xff] }
 0x916   : > { %3488 = vmatprep.mubr.msk.f32.mxu0 %vm3883_vm1, %v3884_v18 }
 0x9e8   : > { %v1573_v24 = vpop.f32.mrb[10].mxu0 }
 0x9e9   : > { %v1577_v25 = vadd.f32 %v1573_v24, %v4169_v12  ;;  %v3441_v26 = vpop.f32.mrb[11].mxu0  ;;  %v3092_v12 = vld [vmem:[%s4595_s1 + $0xa8] sm:$0xff] }
 0x9ea   : > { %v3655_v36 = vpack.c.bf16 %v3092_v12, %v3091_v34 }
 0x9eb   : > { %v4258_v27 = vadd.f32 %v3090_v23, %v1577_v25 }
 0x9ec   : > { %3656 = vmatpush3.bf16.msra.mxu1 %v3655_v36 }
 0x9ed   : > { %v1583_v28 = vsel %vm275_vm0, %v4258_v27, 0.0  ;;  %3657 = vmatprep.subr.bf16.mxu1 %v3882_v10 }
 0x9ee   : > { %1584 = vadd.xlane.f32.xlu0 %v1583_v28 }
 0x9f0   : > { %3659 = vmatpush3.bf16.msra.mxu1 %v3658_v38 }
 0x9f1   : > { %3660 = vmatprep.subr.bf16.mxu1 %v3882_v10 }
 0xa7b   : > { %v1585_v29 = vpop.xlane.xlu0 %1584 }
 0xa7c   : > { %v1586_v30 = vmul.f32 0.03125, %v1585_v29 }
 0xa7e   : > { %v1587_v31 = vsub.f32 %v4258_v27, %v1586_v30 }
 0xa80   : > { %v1588_v32 = vmul.f32 %v1587_v31, %v1587_v31 }
 0xa82   : > { %v1589_v33 = vsel %vm275_vm0, %v1588_v32, 0.0 }
 0xa83   : > { %1590 = vadd.xlane.f32.xlu0 %v1589_v33 }
 0xb10   : > { %v1591_v39 = vpop.xlane.xlu0 %1590 }
 0xb11   : > { %v1592_v40 = vmul.f32 0.03125, %v1591_v39 }
 0xb13   : > { %v1593_v41 = vadd.f32 1e-05, %v1592_v40 }
 0xb15   : > { %3792 = vrsqrt.f32 %v1593_v41 }
 0xb1f   : > { %v3793_v45 = vpop.eup %3792 }
 0xb20   : > { %v1595_v43 = vmul.f32 %v3793_v45, %v1587_v31 }
 0xb22   : > { %3451 = vmatmul.mubr.msk.f32.vlgmr.msra.gmra.mrb[18].mxu1 %vm275_vm0, %v1595_v43 }
 0xb23   : > { %3662 = vmatpush3.bf16.msra.mxu1 %v3661_v46  ;;  %3461 = vmatprep.mubr.msk.f32.mxu1 %vm3883_vm1, %v3884_v18 }
 0xb24   : > { %3663 = vmatprep.subr.bf16.mxu1 %v3882_v10 }
 0xb27   : > { %3665 = vmatpush3.bf16.msra.mxu1 %v3664_v49 }
 0xb28   : > { %3666 = vmatprep.subr.bf16.mxu1 %v3882_v10 }
 0xb2a   : > { %3462 = vmatmul.mubr.msk.f32.vlgmr.msra.gmra.mrb[20].mxu1 %vm275_vm0, %v1595_v43 }
 0xb2b   : > { %3668 = vmatpush3.bf16.msra.mxu1 %v3667_v52  ;;  %3472 = vmatprep.mubr.msk.f32.mxu1 %vm3883_vm1, %v3884_v18 }
 0xb2c   : > { %3669 = vmatprep.subr.bf16.mxu1 %v3882_v10 }
 0xb2f   : > { %3671 = vmatpush3.bf16.msra.mxu1 %v3670_v55 }
 0xb30   : > { %3672 = vmatprep.subr.bf16.mxu1 %v3882_v10 }
 0xb32   : > { %3473 = vmatmul.mubr.msk.f32.vlgmr.msra.gmra.mrb[22].mxu1 %vm275_vm0, %v1595_v43 }
 0xb33   : > { %3674 = vmatpush3.bf16.msra.mxu1 %v3673_v58  ;;  %3483 = vmatprep.mubr.msk.f32.mxu1 %vm3883_vm1, %v3884_v18 }
 0xb34   : > { %3675 = vmatprep.subr.bf16.mxu1 %v3882_v10 }
 0xb37   : > { %3677 = vmatpush3.bf16.msra.mxu1 %v3676_v61 }
 0xb38   : > { %3491 = vmatprep.subr.mxu1 %v3884_v18 }
 0xb3a   : > { %3484 = vmatmul.mubr.msk.f32.vlgmr.msra.gmra.mrb[24].mxu1 %vm275_vm0, %v1595_v43 }
 0xb3b   : > { %3493 = vmatprep.mubr.msk.f32.mxu1 %vm3883_vm1, %v3884_v18 }
 0xbf5   : > { %v1702_v63 = vpop.f32.mrb[18].mxu1 }
 0xbf6   : > { %v1703_v1 = vadd.f32 %v3111_v62, %v1702_v63  ;;  %v3452_v2 = vpop.f32.mrb[19].mxu1 }
 0xbf8   : > { %1919 = vrot.lane.b32.xlu1 %v1703_v1, %s3885_s9 }
 0xbfd   : > { %v1772_v4 = vpop.f32.mrb[20].mxu1 }
 0xbfe   : > { %v4339_v5 = vadd.f32 %v3112_v3, %v1772_v4  ;;  %v3463_v6 = vpop.f32.mrb[21].mxu1 }
 0xc00   : > { %1996 = vrot.lane.b32.xlu0 %v4339_v5, %s3885_s9 }
 0xc05   : > { %v1842_v8 = vpop.f32.mrb[22].mxu1 }
 0xc06   : > { %v4346_v9 = vadd.f32 %v3113_v7, %v1842_v8  ;;  %v3474_v11 = vpop.f32.mrb[23].mxu1 }
 0xc08   : > { %2073 = vrot.lane.b32.xlu1 %v4346_v9, %s3885_s9 }
 0xc0d   : > { %v1912_v14 = vpop.f32.mrb[24].mxu1 }
 0xc0e   : > { %v4353_v15 = vadd.f32 %v3114_v13, %v1912_v14  ;;  %v3485_v16 = vpop.f32.mrb[25].mxu1 }
 0xc0f   : > { %v3132_v16 = vld [vmem:[%s4596_s2 + $0x28] sm:$0xff] }
 0xc10   : > { %2150 = vrot.lane.b32.xlu1 %v4353_v15, %s3885_s9  ;;  %s3001_s9 = sshll.u32 %s269_s23, 4  ;;  %s4553_s9 = int_to_ptr.vmem [resolvable:$true] %s3001_s9 }
 0xc11   : > { %s3818_s14 = scalar_lea.vmem %s4553_s9, 128 }
 0xc12   : > { %p3819_p11 = scmp.ne.s32.totalorder %s4553_s9, %s3818_s14 }
 0xc14   : > { %p3820_p12 = pnand %p3819_p11, %p3970_p5 }
 0xc16   : > { %p3821_p13 = pneg %p3820_p12 }
 0xc6a   : > { %v1920_v19 = vpop.permute.xlu1 %1919 }
 0xc6b   : > { %3487 = vmatpush3.xpose.msk.msra.mxu0 %vm613_vm2, %v1920_v19  ;;  %v3133_v19 = vld [vmem:[%s4596_s2 + $0x30] sm:$0xff] }
 0xc6c   : > { %3496 = vmatprep.subr.mxu0 %v3884_v18 }
 0xc6e   : > { %3489 = vmatmul.mubr.msk.f32.vlgmr.msra.gmra.mrb[12].mxu0 %vm613_vm2, %v1703_v1 }
 0xc6f   : > { %3498 = vmatprep.mubr.msk.f32.mxu0 %vm3883_vm1, %v3884_v18 }
 0xc72   : > { %v1997_v20 = vpop.permute.xlu0 %1996 }
 0xc73   : > { %3492 = vmatpush3.xpose.msk.msra.mxu1 %vm613_vm2, %v1997_v20  ;;  %v3134_v20 = vld [vmem:[%s4596_s2 + $0x38] sm:$0xff] }
 0xc74   : > { %3501 = vmatprep.subr.mxu1 %v3884_v18 }
 0xc76   : > { %3494 = vmatmul.mubr.msk.f32.vlgmr.msra.gmra.mrb[26].mxu1 %vm613_vm2, %v4339_v5 }
 0xc77   : > { %3503 = vmatprep.mubr.msk.f32.mxu1 %vm3883_vm1, %v3884_v18 }
 0xc7a   : > { %v2074_v0 = vpop.permute.xlu1 %2073 }
 0xc7b   : > { %3497 = vmatpush3.xpose.msk.msra.mxu0 %vm613_vm2, %v2074_v0  ;;  %v3679_v0 = vpack.c.bf16 %v3133_v19, %v3132_v16  ;;  %v3161_v16 = vld [vmem:[%s4598_s4 + $0x100] sm:$0xff] }
 0xc7c   : > { %3506 = vmatprep.subr.mxu0 %v3884_v18 }
 0xc7e   : > { %3499 = vmatmul.mubr.msk.f32.vlgmr.msra.gmra.mrb[14].mxu0 %vm613_vm2, %v4346_v9 }
 0xc7f   : > { %3508 = vmatprep.mubr.msk.f32.mxu0 %vm3883_vm1, %v3884_v18 }
 0xc82   : > { %v2151_v21 = vpop.permute.xlu1 %2150 }
 0xc83   : > { %3502 = vmatpush3.xpose.msk.msra.mxu1 %vm613_vm2, %v2151_v21  ;;  %v3135_v21 = vld [vmem:[%s4596_s2 + $0x40] sm:$0xff] }
 0xc84   : > { %3511 = vmatprep.subr.mxu1 %v3884_v18 }
 0xc86   : > { %3504 = vmatmul.mubr.msk.f32.vlgmr.msra.gmra.mrb[28].mxu1 %vm613_vm2, %v4353_v15 }
 0xc87   : > { %3513 = vmatprep.mubr.msk.f32.mxu1 %vm3883_vm1, %v3884_v18 }
 0xd41   : > { %v1991_v23 = vpop.f32.mrb[12].mxu0 }
 0xd42   : > { %v1992_v24 = vadd.f32 %v3119_v22, %v1991_v23  ;;  %v3490_v25 = vpop.f32.mrb[13].mxu0 }
 0xd44   : > { %v2226_v26 = vsel %vm613_vm2, %v1992_v24, -inf }
 0xd45   : > { %2227 = vmax.xlane.f32.xlu0 %v2226_v26 }
 0xd49   : > { %v2068_v28 = vpop.f32.mrb[26].mxu1 }
 0xd4a   : > { %v2069_v29 = vadd.f32 %v3119_v22, %v2068_v28  ;;  %v3495_v30 = vpop.f32.mrb[27].mxu1 }
 0xd4c   : > { %v2229_v31 = vsel %vm613_vm2, %v2069_v29, -inf }
 0xd4d   : > { %2230 = vmax.xlane.f32.xlu1 %v2229_v31 }
 0xd51   : > { %v2145_v32 = vpop.f32.mrb[14].mxu0 }
 0xd52   : > { %v2146_v33 = vadd.f32 %v3119_v22, %v2145_v32  ;;  %v3500_v34 = vpop.f32.mrb[15].mxu0 }
 0xd54   : > { %v2232_v12 = vsel %vm613_vm2, %v2146_v33, -inf }
 0xd55   : > { %2233 = vmax.xlane.f32.xlu0 %v2232_v12 }
 0xd59   : > { %v2222_v35 = vpop.f32.mrb[28].mxu1 }
 0xd5a   : > { %v2223_v36 = vadd.f32 %v3119_v22, %v2222_v35  ;;  %v3505_v37 = vpop.f32.mrb[29].mxu1  ;;  %v3682_v22 = vpack.c.bf16 %v3135_v21, %v3134_v20  ;;  %v3138_v35 = vld [vmem:[%s4596_s2 + $0x48] ss:$0 sm:$0xff] }
 0xd5b   : > { %v3144_v20 = vld [vmem:[%s4597_s3 + $0x48] ss:$0 sm:$0xff] }
 0xd5c   : > { %v2235_v38 = vsel %vm613_vm2, %v2223_v36, -inf }
 0xd5d   : > { %2236 = vmax.xlane.f32.xlu0 %v2235_v38 }
 0xd5e   : > { %2270 = vrot.lane.b32.xlu1 %v1703_v1, %s3886_s19 }
 0xdd2   : > { %v2228_v39 = vpop.xlane.xlu0 %2227 }
 0xdd3   : > { %v2238_v40 = vsub.f32 %v1992_v24, %v2228_v39 }
 0xdd5   : > { %v2242_v41 = vmul.f32 1.442695, %v2238_v40 }
 0xdd7   : > { %3794 = vpow2.f32 %v2242_v41 }
 0xdda   : > { %v2231_v42 = vpop.xlane.xlu1 %2230 }
 0xddb   : > { %v2239_v44 = vsub.f32 %v2069_v29, %v2231_v42 }
 0xddd   : > { %v2244_v45 = vmul.f32 1.442695, %v2239_v44 }
 0xdde   : > { %v2271_v46 = vpop.permute.xlu1 %2270 }
 0xddf   : > { %3796 = vpow2.f32 %v2244_v45  ;;  %3507 = vmatpush3.msra.mxu0 %v2271_v46 }
 0xde0   : > { %3516 = vmatprep.subr.mxu0 %v3884_v18 }
 0xde1   : > { %v3795_v43 = vpop.eup %3794 }
 0xde2   : > { %v2234_v47 = vpop.xlane.xlu0 %2233  ;;  %v2250_v48 = vsel %vm613_vm2, %v3795_v43, 0.0 }
 0xde3   : > { %v2240_v49 = vsub.f32 %v2146_v33, %v2234_v47  ;;  %2251 = vadd.xlane.f32.xlu1 %v2250_v48  ;;  %v3141_v47 = vld [vmem:[%s4597_s3 + $0x38] sm:$0xff] }
 0xde5   : > { %v2246_v50 = vmul.f32 1.442695, %v2240_v49  ;;  %v3142_v49 = vld [vmem:[%s4597_s3 + $0x40] sm:$0xff] }
 0xde7   : > { %3798 = vpow2.f32 %v2246_v50  ;;  %v3688_v50 = vpack.c.bf16 %v3142_v49, %v3141_v47  ;;  %v3163_v49 = vld [vmem:[%s4598_s4 + $0x108] ss:$0 sm:$0xff] }
 0xde9   : > { %v3797_v51 = vpop.eup %3796 }
 0xdea   : > { %v2237_v52 = vpop.xlane.xlu0 %2236  ;;  %v2253_v53 = vsel %vm613_vm2, %v3797_v51, 0.0 }
 0xdeb   : > { %v2241_v54 = vsub.f32 %v2223_v36, %v2237_v52  ;;  %2254 = vadd.xlane.f32.xlu0 %v2253_v53 }
 0xded   : > { %v2248_v55 = vmul.f32 1.442695, %v2241_v54 }
 0xdef   : > { %3800 = vpow2.f32 %v2248_v55 }
 0xdf1   : > { %v3799_v56 = vpop.eup %3798 }
 0xdf2   : > { %v2256_v57 = vsel %vm613_vm2, %v3799_v56, 0.0 }
 0xdf3   : > { %2257 = vadd.xlane.f32.xlu1 %v2256_v57  ;;  %v3147_v57 = vld [vmem:[%s4598_s4 + $0x90] sm:$0xff] }
 0xdf9   : > { %v3801_v58 = vpop.eup %3800 }
 0xdfa   : > { %v2259_v59 = vsel %vm613_vm2, %v3801_v58, 0.0 }
 0xdfb   : > { %2260 = vadd.xlane.f32.xlu0 %v2259_v59  ;;  %v3148_v59 = vld [vmem:[%s4598_s4 + $0x98] sm:$0xff] }
 0xe04   : > { %2422 = vrot.lane.b32.xlu1 %v4346_v9, %s3886_s19 }
 0xe08   : > { %2498 = vrot.lane.b32.xlu1 %v4353_v15, %s3886_s19 }
 0xe11   : > { %2346 = vrot.lane.b32.xlu0 %v4339_v5, %s3886_s19 }
 0xe70   : > { %v2252_v60 = vpop.xlane.xlu1 %2251 }
 0xe71   : > { %3802 = vrcp.f32 %v2252_v60 }
 0xe78   : > { %v2255_v63 = vpop.xlane.xlu0 %2254 }
 0xe79   : > { %3804 = vrcp.f32 %v2255_v63 }
 0xe7b   : > { %v3803_v61 = vpop.eup %3802 }
 0xe7c   : > { %v2263_v62 = vmul.f32 %v3803_v61, %v3795_v43  ;;  %v3139_v43 = vld [vmem:[%s4597_s3 + $0x28] sm:$0xff] }
 0xe7d   : > { %v3150_v61 = vld [vmem:[%s4598_s4 + $0xa8] sm:$0xff] }
 0xe7e   : > { %3509 = vmatmul.mubr.msk.f32.vlgmr.msra.gmra.mrb[16].mxu0 %vm613_vm2, %v2263_v62  ;;  %v3151_v62 = vld [vmem:[%s4598_s4 + $0xb0] sm:$0xff] }
 0xe7f   : > { %3518 = vmatprep.mubr.msk.f32.mxu0 %vm3883_vm1, %v3884_v18  ;;  %v3697_v63 = vpack.c.bf16 %v3151_v62, %v3150_v61 }
 0xe80   : > { %v2258_v1 = vpop.xlane.xlu1 %2257 }
 0xe81   : > { %3806 = vrcp.f32 %v2258_v1  ;;  %v3152_v1 = vld [vmem:[%s4598_s4 + $0xb8] sm:$0xff] }
 0xe83   : > { %v3805_v4 = vpop.eup %3804 }
 0xe84   : > { %v2423_v2 = vpop.permute.xlu1 %2422  ;;  %v2265_v6 = vmul.f32 %v3805_v4, %v3797_v51  ;;  %v3154_v4 = vld [vmem:[%s4598_s4 + $0xc8] sm:$0xff] }
 0xe85   : > { %3517 = vmatpush3.msra.mxu0 %v2423_v2  ;;  %v3153_v2 = vld [vmem:[%s4598_s4 + $0xc0] sm:$0xff] }
 0xe86   : > { %3678 = vmatprep.subr.bf16.mxu0 %v3882_v10 }
 0xe88   : > { %v2261_v3 = vpop.xlane.xlu0 %2260  ;;  %v2499_v9 = vpop.permute.xlu1 %2498 }
 0xe89   : > { %3808 = vrcp.f32 %v2261_v3  ;;  %v3700_v3 = vpack.c.bf16 %v3153_v2, %v3152_v1 }
 0xe8b   : > { %v3807_v5 = vpop.eup %3806 }
 0xe8c   : > { %v2267_v7 = vmul.f32 %v3807_v5, %v3799_v56  ;;  %v2347_v8 = vpop.permute.xlu0 %2346  ;;  %v3146_v56 = vld [vmem:[%s4598_s4 + $0x88] sm:$0xff]  ;;  %v3155_v5 = vld [vmem:[%s4598_s4 + $0xd0] sm:$0xff] }
 0xe8d   : > { %3512 = vmatpush3.msra.mxu1 %v2347_v8  ;;  %v3157_v8 = vld [vmem:[%s4598_s4 + $0xe0] sm:$0xff] }
 0xe8e   : > { %3514 = vmatmul.mubr.msk.f32.vlgmr.msra.gmra.mrb[30].mxu1 %vm613_vm2, %v2265_v6  ;;  %3519 = vmatmul.mubr.msk.f32.vlgmr.msra.gmra.mrb[18].mxu0 %vm613_vm2, %v2267_v7  ;;  %v3703_v6 = vpack.c.bf16 %v3155_v5, %v3154_v4  ;;  %v3156_v7 = vld [vmem:[%s4598_s4 + $0xd8] sm:$0xff] }
 0xe8f   : > { %3521 = vmatprep.subr.mxu1 %v3884_v18  ;;  %3523 = vmatprep.mubr.msk.f32.mxu1 %vm3883_vm1, %v3884_v18 }
 0xe90   : > { %3522 = vmatpush3.msra.mxu1 %v2499_v9  ;;  %3534 = vmatprep.mubr.msk.f32.mxu0 %vm3883_vm1, %v3884_v18  ;;  %v3706_v9 = vpack.c.bf16 %v3157_v8, %v3156_v7 }
 0xe91   : > { %3684 = vmatprep.subr.bf16.mxu1 %v3882_v10  ;;  %3680 = vmatpush3.bf16.msra.mxu0 %v3679_v0 }
 0xe92   : > { %3681 = vmatprep.subr.bf16.mxu0 %v3882_v10 }
 0xe93   : > { %v3809_v11 = vpop.eup %3808 }
 0xe94   : > { %v2269_v13 = vmul.f32 %v3809_v11, %v3801_v58  ;;  %v3691_v58 = vpack.c.bf16 %v3147_v57, %v3146_v56  ;;  %v3158_v11 = vld [vmem:[%s4598_s4 + $0xe8] sm:$0xff] }
 0xe95   : > { %3683 = vmatpush3.bf16.msra.mxu0 %v3682_v22 }
 0xe96   : > { %3524 = vmatmul.mubr.msk.f32.vlgmr.msra.gmra.mrb[32].mxu1 %vm613_vm2, %v2269_v13  ;;  %3690 = vmatprep.subr.bf16.mxu0 %v3882_v10  ;;  %v3159_v13 = vld [vmem:[%s4598_s4 + $0xf0] sm:$0xff] }
 0xe97   : > { %3545 = vmatprep.mubr.msk.f32.mxu1 %vm3883_vm1, %v3884_v18 }
 0xf51   : > { %v2342_v14 = vpop.f32.mrb[16].mxu0 }
 0xf52   : > { %v3510_v15 = vpop.f32.mrb[17].mxu0 }
 0xf53   : > { %v3160_v15 = vld [vmem:[%s4598_s4 + $0xf8] sm:$0xff] }
 0xf54   : > { %v3712_v19 = vpack.c.bf16 %v3161_v16, %v3160_v15 }
 0xf61   : > { %v2418_v23 = vpop.f32.mrb[30].mxu1  ;;  %v2494_v24 = vpop.f32.mrb[18].mxu0 }
 0xf62   : > { %2579 = vrot.lane.b32.xlu1 %v2494_v24, %s3887_s15  ;;  %v3520_v25 = vpop.f32.mrb[19].mxu0  ;;  %2575 = vrot.lane.b32.xlu0 %v2418_v23, %s3888_s16  ;;  %v3515_v26 = vpop.f32.mrb[31].mxu1 }
 0xf69   : > { %v2570_v28 = vpop.f32.mrb[32].mxu1 }
 0xf6a   : > { %2583 = vrot.lane.b32.xlu0 %v2570_v28, %s3889_s17  ;;  %v3525_v29 = vpop.f32.mrb[33].mxu1  ;;  %s3167_s17 = sshll.u32 %s3953_s28, 7  ;;  %s3891_s28 = smov [#allocation2]  }
 0xf6b   : > { %s4551_s8 = scalar_lea.hbm %s4601_s7, %s3167_s17  ;;  %s3822_s18 = sshll.u32 %s3891_s28, 4  ;;  %s3823_s18 = int_to_ptr.vmem [resolvable:$false] %s3822_s18 }
 0xf6c   : > { %s3824_s20 = scalar_lea.vmem %s3823_s18, 256  ;;  %p3825_p0 = scmp.lt.s32.totalorder %s4553_s9, %s3823_s18 }
 0xf6d   : > { %p3826_p1 = scmp.lt.s32.totalorder %s3824_s20, %s3818_s14 }
 0xf6f   : > { %p3827_p2 = por %p3826_p1, %p3825_p0 }
 0xf71   : > { %p3828_p3 = pnand %p3827_p2, %p3821_p13 }
 0xfd4   : > { %v2576_v30 = vpop.permute.xlu0 %2575  ;;  %v2580_v31 = vpop.permute.xlu1 %2579 }
 0xfd5   : > { %v2586_v32 = vsel %vm613_vm2, %v2342_v14, %v2576_v30  ;;  %v3709_v14 = vpack.c.bf16 %v3159_v13, %v3158_v11 }
 0xfd6   : > { %v2587_v33 = vsel %vm1280_vm3, %v2586_v32, %v2580_v31 }
 0xfdc   : > { %v2584_v34 = vpop.permute.xlu0 %2583 }
 0xfdd   : > { %v2588_v12 = vsel %vm1282_vm4, %v2587_v33, %v2584_v34 }
 0xfde   : > { %3535 = vmatmul.mubr.msk.f32.vlgmr.msra.gmra.mrb[20].mxu0 %vm275_vm0, %v2588_v12 }
 0xfdf   : > { %3580 = vmatprep.mubr.msk.f32.mxu0 %vm3883_vm1, %v3884_v18  ;;  %3692 = vmatpush3.bf16.msra.mxu0 %v3691_v58  ;;  %v2904_v58 = vld [vmem:[%s4600_s6] sm:$0xff] }
 0xfe0   : > { %3693 = vmatprep.subr.bf16.mxu0 %v3882_v10 }
0x10b1   : > { %v2664_v36 = vpop.f32.mrb[20].mxu0 }
0x10b2   : > { %v2668_v37 = vadd.f32 %v2664_v36, %v4258_v27  ;;  %v3536_v38 = vpop.f32.mrb[21].mxu0  ;;  %v3140_v27 = vld [vmem:[%s4597_s3 + $0x30] sm:$0xff] }
0x10b3   : > { %v3685_v48 = vpack.c.bf16 %v3140_v27, %v3139_v43 }
0x10b4   : > { %v4441_v39 = vadd.f32 %v3138_v35, %v2668_v37 }
0x10b5   : > { %3686 = vmatpush3.bf16.msra.mxu1 %v3685_v48 }
0x10b6   : > { %v2674_v40 = vsel %vm275_vm0, %v4441_v39, 0.0  ;;  %3687 = vmatprep.subr.bf16.mxu1 %v3882_v10 }
0x10b7   : > { %2675 = vadd.xlane.f32.xlu1 %v2674_v40 }
0x10b9   : > { %3689 = vmatpush3.bf16.msra.mxu1 %v3688_v50 }
0x10ba   : > { %3714 = vmatprep.subr.bf16.mxu1 %v3882_v10 }
0x1144   : > { %v2676_v41 = vpop.xlane.xlu1 %2675 }
0x1145   : > { %v2677_v42 = vmul.f32 0.03125, %v2676_v41 }
0x1147   : > { %v2678_v44 = vsub.f32 %v4441_v39, %v2677_v42 }
0x1149   : > { %v2679_v45 = vmul.f32 %v2678_v44, %v2678_v44 }
0x114b   : > { %v2680_v46 = vsel %vm275_vm0, %v2679_v45, 0.0 }
0x114c   : > { %2681 = vadd.xlane.f32.xlu0 %v2680_v46 }
0x11d9   : > { %v2682_v51 = vpop.xlane.xlu0 %2681 }
0x11da   : > { %v2683_v52 = vmul.f32 0.03125, %v2682_v51 }
0x11dc   : > { %v2684_v53 = vadd.f32 1e-05, %v2683_v52 }
0x11de   : > { %3810 = vrsqrt.f32 %v2684_v53 }
0x11e8   : > { %v3811_v54 = vpop.eup %3810 }
0x11e9   : > { %v2686_v55 = vmul.f32 %v3811_v54, %v2678_v44 }
0x11eb   : > { %3546 = vmatmul.mubr.msk.f32.vlgmr.msra.gmra.mrb[34].mxu1 %vm275_vm0, %v2686_v55 }
0x11ec   : > { %3591 = vmatprep.mubr.msk.f32.mxu1 %vm3883_vm1, %v3884_v18  ;;  %v3149_v18 = vld [vmem:[%s4598_s4 + $0xa0] sm:$0xff] }
0x11ed   : > { %v3694_v60 = vpack.c.bf16 %v3149_v18, %v3148_v59  ;;  %v2906_v18 = vld [vmem:[%s4600_s6 + $0x10] sm:$0xff] }
0x11ef   : > { %3695 = vmatpush3.bf16.msra.mxu0 %v3694_v60  ;;  %v2907_v60 = vld [vmem:[%s4600_s6 + $0x18] sm:$0xff] }
0x11f0   : > { %3696 = vmatprep.subr.bf16.mxu0 %v3882_v10  ;;  %v3718_v61 = vpack.c.bf16 %v2907_v60, %v2906_v18 }
0x11f3   : > { %3698 = vmatpush3.bf16.msra.mxu0 %v3697_v63 }
0x11f4   : > { %3699 = vmatprep.subr.bf16.mxu0 %v3882_v10 }
0x11f7   : > { %3701 = vmatpush3.bf16.msra.mxu0 %v3700_v3 }
0x11f8   : > { %3702 = vmatprep.subr.bf16.mxu0 %v3882_v10 }
0x11fb   : > { %3704 = vmatpush3.bf16.msra.mxu0 %v3703_v6 }
0x11fc   : > { %3705 = vmatprep.subr.bf16.mxu0 %v3882_v10 }
0x11ff   : > { %3707 = vmatpush3.bf16.msra.mxu0 %v3706_v9 }
0x1200   : > { %3708 = vmatprep.subr.bf16.mxu0 %v3882_v10 }
0x1203   : > { %3710 = vmatpush3.bf16.msra.mxu0 %v3709_v14 }
0x1204   : > { %3711 = vmatprep.subr.bf16.mxu0 %v3882_v10 }
0x1207   : > { %3713 = vmatpush3.bf16.msra.mxu0 %v3712_v19 }
0x12be   : > { %v2766_v0 = vpop.f32.mrb[34].mxu1 }
0x12bf   : > { %v2767_v21 = vadd.f32 %v3144_v20, %v2766_v0  ;;  %v3547_v22 = vpop.f32.mrb[35].mxu1 }
0x12c1   : > { %v2771_v23 = vmul.f32 0.70710677, %v2767_v21  ;;  %v2770_v43 = vmul.f32 0.5, %v2767_v21 }
0x12c3   : > { %v2774_v24 = vand.u32 2147483647, %v2771_v23  ;;  %vm2772_vm6 = vcmp.ge.f32.partialorder %v2771_v23, 0.0 }
0x12c4   : > { %v2773_v45 = vsel %vm2772_vm6, 1.0, %v3890_v17 }
0x12c5   : > { %v2775_v25 = vmul.f32 0.3275911, %v2774_v24  ;;  %v2788_v28 = vmul.f32 %v2774_v24, %v2774_v24 }
0x12c7   : > { %v2776_v26 = vadd.f32 1.0, %v2775_v25  ;;  %v2789_v30 = vsub.f32 0.0, %v2788_v28 }
0x12c9   : > { %3812 = vrcp.f32 %v2776_v26  ;;  %v2790_v33 = vmul.f32 1.442695, %v2789_v30 }
0x12cb   : > { %3814 = vpow2.f32 %v2790_v33 }
0x12d3   : > { %v3813_v29 = vpop.eup %3812 }
0x12d4   : > { %v2779_v31 = vmul.f32 1.0614054, %v3813_v29 }
0x12d5   : > { %v3815_v41 = vpop.eup %3814 }
0x12d6   : > { %v2780_v32 = vadd.f32 -1.4531521, %v2779_v31 }
0x12d8   : > { %v2781_v34 = vmul.f32 %v3813_v29, %v2780_v32 }
0x12da   : > { %v2782_v12 = vadd.f32 1.4214138, %v2781_v34 }
0x12dc   : > { %v2783_v35 = vmul.f32 %v3813_v29, %v2782_v12 }
0x12de   : > { %v2784_v36 = vadd.f32 -0.28449672, %v2783_v35 }
0x12e0   : > { %v2785_v37 = vmul.f32 %v3813_v29, %v2784_v36 }
0x12e2   : > { %v2786_v38 = vadd.f32 0.2548296, %v2785_v37 }
0x12e4   : > { %v2787_v40 = vmul.f32 %v3813_v29, %v2786_v38 }
0x12e6   : > { %v2792_v42 = vmul.f32 %v3815_v41, %v2787_v40 }
0x12e8   : > { %v2793_v44 = vsub.f32 1.0, %v2792_v42 }
0x12ea   : > { %v2794_v46 = vmul.f32 %v2793_v44, %v2773_v45 }
0x12ec   : > { %v2795_v27 = vadd.f32 1.0, %v2794_v46 }
0x12ee   : > { %v2796_v47 = vmul.f32 %v2795_v27, %v2770_v43 }
0x12f0   : > { %3581 = vmatmul.mubr.f32.vlgmr.msra.gmra.mrb[22].mxu0 %v2796_v47 }
0x13c3   : > { %v2881_v48 = vpop.f32.mrb[22].mxu0 }
0x13c4   : > { %v2885_v50 = vadd.f32 %v2881_v48, %v4441_v39  ;;  %v3582_v51 = vpop.f32.mrb[23].mxu0  ;;  %v2905_v39 = vld [vmem:[%s4600_s6 + $0x8] sm:$0xff] }
0x13c5   : > { %v3715_v59 = vpack.c.bf16 %v2905_v39, %v2904_v58 }
0x13c6   : > { %v2890_v52 = vadd.f32 %v3163_v49, %v2885_v50 }
0x13c7   : > { %3716 = vmatpush3.bf16.msra.mxu1 %v3715_v59 }
0x13c8   : > { %v2891_v53 = vsel %vm275_vm0, %v2890_v52, 0.0  ;;  %3717 = vmatprep.subr.bf16.mxu1 %v3882_v10  ;;  %v3164_v10 = vld [vmem:[%s4600_s6 + $0x20] ss:$0 sm:$0xff] }
0x13c9   : > { %2892 = vadd.xlane.f32.xlu0 %v2891_v53 }
0x13cb   : > { %3719 = vmatpush3.bf16.msra.mxu1 %v3718_v61 }
0x1456   : > { %v2893_v54 = vpop.xlane.xlu0 %2892 }
0x1457   : > { %v2894_v55 = vmul.f32 0.03125, %v2893_v54 }
0x1459   : > { %v2895_v17 = vsub.f32 %v2890_v52, %v2894_v55 }
0x145b   : > { %v2896_v56 = vmul.f32 %v2895_v17, %v2895_v17 }
0x145d   : > { %v2897_v57 = vsel %vm275_vm0, %v2896_v56, 0.0 }
0x145e   : > { %2898 = vadd.xlane.f32.xlu1 %v2897_v57 }
0x14eb   : > { %v2899_v62 = vpop.xlane.xlu1 %2898 }
0x14ec   : > { %v2900_v63 = vmul.f32 0.03125, %v2899_v62 }
0x14ee   : > { %v2901_v1 = vadd.f32 1e-05, %v2900_v63 }
0x14f0   : > { %3816 = vrsqrt.f32 %v2901_v1 }
0x14fa   : > { %v3817_v2 = vpop.eup %3816 }
0x14fb   : > { %v2903_v3 = vmul.f32 %v3817_v2, %v2895_v17 }
0x14fd   : > { %3592 = vmatmul.mubr.msk.f32.vlgmr.msra.gmra.mrb[36].mxu1 %vm275_vm0, %v2903_v3 }
0x15d0   : > { %v2982_v4 = vpop.f32.mrb[36].mxu1 }
0x15d1   : > { %v2983_v5 = vadd.f32 %v3164_v10, %v2982_v4  ;;  %v3593_v6 = vpop.f32.mrb[37].mxu1 }
0x15d3   : > { %2986 = vst.msk [vmem:[%s269_s23] sm:$0xff] %vm275_vm0, %v2983_v5 }
0x15d4   : > { %3831 = shalt.err (!%p3828_p3)
}
0x15d5   : > { %s3832_s21 = scalar_lea.hbm %s4551_s8, 128  ;;  %s3836_s16 = scalar_lea.hbm %s4601_s7, 256 }
0x15d6   : > { %p3833_p4 = scmp.ne.s32.totalorder %s4551_s8, %s3832_s21  ;;  %p3837_p9 = scmp.lt.u32.totalorder %s4551_s8, %s4601_s7 }
0x15d7   : > { %p3838_p10 = scmp.lt.u32.totalorder %s3836_s16, %s3832_s21  ;;  %p3840_p12 = scmp.lt.u32.totalorder %s3832_s21, %s4551_s8 }
0x15d8   : > { %p3834_p7 = pnand %p3833_p4, %p3970_p5 }
0x15d9   : > { %p3839_p11 = por %p3838_p10, %p3837_p9 }
0x15da   : > { %p3835_p8 = pneg %p3834_p7 }
0x15db   : > { %p3841_p13 = por %p3840_p12, %p3839_p11 }
0x15dd   : > { %p3842_p0 = pnand %p3841_p13, %p3835_p8 }
0x15df   : > { %3845 = shalt.err (!%p3842_p0)
}
0x15e0   : > { %3720 = dma.vmem_to_hbm [thread:$0]  (%p3970_p5), %s4553_s9, 128, %s4551_s8, %s2988_s13  }
0x15e1 PF: > { %p3726_p1 = scmp.ge.s32.totalorder %s3880_s27, 2  ;;  %s3013_s29 = sand.u32 1, %s3868_s24  }
0x15e2   : > { %s3014_s19 = scalar_lea.sflag [#allocation3], %s3013_s29 }
0x15e3   : > { %p3723_p2 = pnand %p3726_p1, %p3974_p6 }
0x15e5   : > { %3863 = dma.done.wait (!%p3723_p2), %s3014_s19, 128  }
0x15e6   : > { %3865 = vsyncadd (!%p3723_p2), %s3014_s19, 4294967168  ;;  %p17_p3 = scmp.ge.s32.totalorder %s3957_s30, 4   ;;  %s4604_s24 = smov %s3872_s25 }
0x15e7   : > { %s4605_s25 = smov %s3876_s26  ;;  %s4606_s26 = smov %s3968_s10 }
0x15e8   : > { %s4607_s27 = smov %s3957_s30  ;;  %19 = sbr.rel (!%p17_p3) target bundleno = 3 (0x3), region = 88 }
0x15ef   :  { %3019 = vsyncpa [#allocation3], 1 }
0x15f0   :  { %3021 = vsyncpa [#allocation3 + $0x1], 1 }

</bundles_post_ra>
